<compile_context>
chip_gen: v7x
topology: tpu7x:2x2x1
jax: 0.10.0
libtpu: 0.0.40
codegen_flags: <defaults>
</compile_context>

<pallas_src>
import numpy as np
import jax
import jax.numpy as jnp
from jax.experimental import pallas as pl
from jax.experimental.pallas import tpu as pltpu

B = 2
H = W = 16
C1 = 16            # channels of first backbone conv
HIDDEN = 32        # model.hidden_dim == channels of second backbone conv
ACTION_DIM = 4
HW = H * W
BHW = B * HW       # 512 -> lane axis of every activation
K1 = 16            # conv1 im2col contraction (9 taps zero-padded to 16)
K2 = 9 * C1        # conv2 im2col contraction = 144
PACK = 128         # packed output lane width: [q | h | c | zero-pad]


def _make_masks():
    """(9, BHW) f32 border masks; masks[k, b*HW + y*W + x] == 1 iff tap
    k = dy*3 + dx reads an in-bounds spatial position (y+dy-1, x+dx-1)."""
    ys, xs = np.meshgrid(np.arange(H), np.arange(W), indexing="ij")
    m = np.zeros((9, BHW), np.float32)
    for k in range(9):
        dy, dx = k // 3, k % 3
        valid = ((ys + dy - 1 >= 0) & (ys + dy - 1 < H) &
                 (xs + dx - 1 >= 0) & (xs + dx - 1 < W))
        m[k] = np.tile(valid.reshape(-1).astype(np.float32), B)
    return jnp.asarray(m)


_MASKS = _make_masks()
# roll amount per tap so that rolled[p] == x[p + (dy-1)*W + (dx-1)]
_TAP_SHIFT = tuple(int((-((k // 3 - 1) * W + (k % 3 - 1))) % BHW)
                   for k in range(9))


# ---------------------------------------------------------------------------
# Single fused kernel: conv1 -> conv2 -> global-avg-pool -> LSTM cell -> head.
# ---------------------------------------------------------------------------
def _qnet_kernel(x_ref, masks_ref, w1t_ref, b1_ref, w2t_ref, b2_ref,
                 pool_ref, h0_ref, c0_ref, wih_ref, whh_ref, bg_ref,
                 wo_ref, bo_ref, out_ref, p1_ref, p2_ref):
    # ---- conv1: 3x3 "same", Cin=1 -> C1; im2col patch (16,512) + one MXU dot.
    x = x_ref[...]                                             # (1, BHW)
    p1_ref[...] = jnp.zeros_like(p1_ref)                       # rows 9..15 = 0
    for k in range(9):
        s = _TAP_SHIFT[k]
        shifted = x if s == 0 else pltpu.roll(x, shift=s, axis=1)
        val = shifted if k == 4 else shifted * masks_ref[pl.ds(k, 1), :]
        p1_ref[pl.ds(k, 1), :] = val
    y1 = jnp.maximum(
        jnp.dot(w1t_ref[...], p1_ref[...],
                preferred_element_type=jnp.float32) + b1_ref[...],
        0.0)                                                   # (C1, BHW)

    # ---- conv2: 3x3 "same", C1 -> HIDDEN; single K=144 im2col MXU dot.
    for k in range(9):
        s = _TAP_SHIFT[k]
        shifted = y1 if s == 0 else pltpu.roll(y1, shift=s, axis=1)
        val = shifted if k == 4 else shifted * masks_ref[pl.ds(k, 1), :]
        p2_ref[pl.ds(k * C1, C1), :] = val                     # sublane-aligned
    y2 = jnp.maximum(
        jnp.dot(w2t_ref[...], p2_ref[...],
                preferred_element_type=jnp.float32) + b2_ref[...],
        0.0)                                                   # (HIDDEN, BHW)

    # ---- adaptive_avg_pool2d((1,1)): per-sample spatial mean via one MXU dot.
    feat_t = jnp.dot(y2, pool_ref[...],
                     preferred_element_type=jnp.float32)       # (HIDDEN, B)
    feat = feat_t.T                                            # (B, HIDDEN)

    # ---- single-step LSTM cell, fused gate weights (order i, f, g, o).
    gates = (jnp.dot(feat, wih_ref[...], preferred_element_type=jnp.float32)
             + jnp.dot(h0_ref[...], whh_ref[...],
                       preferred_element_type=jnp.float32)
             + bg_ref[...])                                    # (B, 4*HIDDEN)
    i_g = jax.nn.sigmoid(gates[:, 0 * HIDDEN:1 * HIDDEN])
    f_g = jax.nn.sigmoid(gates[:, 1 * HIDDEN:2 * HIDDEN])
    g_g = jnp.tanh(gates[:, 2 * HIDDEN:3 * HIDDEN])
    o_g = jax.nn.sigmoid(gates[:, 3 * HIDDEN:4 * HIDDEN])
    c_new = f_g * c0_ref[...] + i_g * g_g
    h_new = o_g * jnp.tanh(c_new)

    # ---- output Linear head + lane-dense packed output (q | h | c | 0-pad).
    q = (jnp.dot(h_new, wo_ref[...], preferred_element_type=jnp.float32)
         + bo_ref[...])
    out_ref[...] = jnp.zeros_like(out_ref)
    out_ref[:, 0:ACTION_DIM] = q
    out_ref[:, ACTION_DIM:ACTION_DIM + HIDDEN] = h_new
    out_ref[:, ACTION_DIM + HIDDEN:ACTION_DIM + 2 * HIDDEN] = c_new


# ---------------------------------------------------------------------------
# Full QNetwork.forward
# ---------------------------------------------------------------------------
def qnetwork_forward(params, state, h0, c0):
    """state: (B, H, W) or (B, 1, H, W); h0, c0: (1, B, HIDDEN).

    Returns (q, h0_out, c0_out) shaped (B, ACTION_DIM), (1, B, HIDDEN),
    (1, B, HIDDEN) — matching the PyTorch module.
    """
    if state.ndim == 4:
        state = state[:, 0]
    x_flat = state.reshape(1, BHW).astype(jnp.float32)

    # Kernel-layout weights (tiny, folded by XLA outside the kernel).
    w1t = jnp.zeros((C1, K1), jnp.float32).at[:, :9].set(
        params["w1"].reshape(9, C1).T)                    # (16, 16), cols 9..15 = 0
    w2t = params["w2"].reshape(K2, HIDDEN).T              # (32, 144)
    b1c = params["b1"].reshape(C1, 1)
    b2c = params["b2"].reshape(HIDDEN, 1)
    pool = jnp.repeat(jnp.eye(B, dtype=jnp.float32), HW, axis=0) / HW  # (BHW, B)
    bg = params["b_gates"].reshape(1, 4 * HIDDEN)
    bo = params["b_out"].reshape(1, ACTION_DIM)

    vmem = pl.BlockSpec(memory_space=pltpu.MemorySpace.VMEM)
    packed = pl.pallas_call(
        _qnet_kernel,
        out_shape=jax.ShapeDtypeStruct((B, PACK), jnp.float32),
        in_specs=[vmem] * 14,
        out_specs=vmem,
        scratch_shapes=[pltpu.VMEM((K1, BHW), jnp.float32),    # conv1 im2col
                        pltpu.VMEM((K2, BHW), jnp.float32)],   # conv2 im2col
    )(x_flat, _MASKS, w1t, b1c, w2t, b2c, pool,
      h0[0].astype(jnp.float32), c0[0].astype(jnp.float32),
      params["w_ih"], params["w_hh"], bg, params["w_out"], bo)

    q = packed[:, 0:ACTION_DIM]
    h_new = packed[:, ACTION_DIM:ACTION_DIM + HIDDEN]
    c_new = packed[:, ACTION_DIM + HIDDEN:ACTION_DIM + 2 * HIDDEN]
    return q, h_new[None], c_new[None]


# ---------------------------------------------------------------------------
# Deterministic parameter init (synthetic backbone + fused-gate LSTM + head)
# ---------------------------------------------------------------------------
def init_params(key):
    ks = jax.random.split(key, 8)
    w1 = jax.random.normal(ks[0], (3, 3, 1, C1), jnp.float32) * 0.3
    b1 = jax.random.normal(ks[1], (C1,), jnp.float32) * 0.05
    w2 = jax.random.normal(ks[2], (3, 3, C1, HIDDEN), jnp.float32) * 0.08
    b2 = jax.random.normal(ks[3], (HIDDEN,), jnp.float32) * 0.05
    s = 1.0 / jnp.sqrt(HIDDEN)
    # fused-gate layout: columns ordered (i, f, g, o), each HIDDEN wide
    w_ih = jax.random.uniform(ks[4], (HIDDEN, 4 * HIDDEN), jnp.float32, -s, s)
    w_hh = jax.random.uniform(ks[5], (HIDDEN, 4 * HIDDEN), jnp.float32, -s, s)
    b_gates = jax.random.uniform(ks[6], (4 * HIDDEN,), jnp.float32, -s, s) * 2.0
    # kaiming_uniform_(nonlinearity='linear') on the output Linear
    bound = jnp.sqrt(3.0) / jnp.sqrt(HIDDEN)
    w_out = jax.random.uniform(ks[7], (HIDDEN, ACTION_DIM), jnp.float32,
                               -bound, bound)
    b_out = jnp.zeros((ACTION_DIM,), jnp.float32)
    return dict(w1=w1, b1=b1, w2=w2, b2=b2, w_ih=w_ih, w_hh=w_hh,
                b_gates=b_gates, w_out=w_out, b_out=b_out)


# ---------------------------------------------------------------------------
# Pure-JAX reference (independent conv via lax.conv_general_dilated)
# ---------------------------------------------------------------------------
def reference_forward(params, state, h0, c0):
    if state.ndim == 4:
        state = state[:, 0]
    x = state[..., None].astype(jnp.float32)
    dn = ("NHWC", "HWIO", "NHWC")
    y1 = jax.lax.conv_general_dilated(x, params["w1"], (1, 1), "SAME",
                                      dimension_numbers=dn,
                                      precision=jax.lax.Precision.HIGHEST)
    y1 = jnp.maximum(y1 + params["b1"], 0.0)
    y2 = jax.lax.conv_general_dilated(y1, params["w2"], (1, 1), "SAME",
                                      dimension_numbers=dn,
                                      precision=jax.lax.Precision.HIGHEST)
    y2 = jnp.maximum(y2 + params["b2"], 0.0)
    feat = y2.mean(axis=(1, 2))                          # (B, HIDDEN)
    h0b, c0b = h0[0], c0[0]
    gates = feat @ params["w_ih"] + h0b @ params["w_hh"] + params["b_gates"]
    i_g = jax.nn.sigmoid(gates[:, 0 * HIDDEN:1 * HIDDEN])
    f_g = jax.nn.sigmoid(gates[:, 1 * HIDDEN:2 * HIDDEN])
    g_g = jnp.tanh(gates[:, 2 * HIDDEN:3 * HIDDEN])
    o_g = jax.nn.sigmoid(gates[:, 3 * HIDDEN:4 * HIDDEN])
    c_new = f_g * c0b + i_g * g_g
    h_new = o_g * jnp.tanh(c_new)
    q = h_new @ params["w_out"] + params["b_out"]
    return q, h_new[None], c_new[None]


if __name__ == "__main__":
    key = jax.random.PRNGKey(0)
    pkey, skey = jax.random.split(key)
    params = init_params(pkey)
    state = jax.random.normal(skey, (B, H, W), jnp.float32)
    # initialize_lstm_states: constant 0.01
    h0 = jnp.full((1, B, HIDDEN), 0.01, jnp.float32)
    c0 = jnp.full((1, B, HIDDEN), 0.01, jnp.float32)

    q, h_out, c_out = jax.block_until_ready(
        jax.jit(qnetwork_forward)(params, state, h0, c0))

    q_ref, h_ref, c_ref = reference_forward(params, state, h0, c0)
    assert q.shape == (B, ACTION_DIM)
    assert h_out.shape == (1, B, HIDDEN) and c_out.shape == (1, B, HIDDEN)
    for got, want in ((q, q_ref), (h_out, h_ref), (c_out, c_ref)):
        if not jnp.allclose(got, want, atol=1e-2, rtol=1e-2):
            raise AssertionError("Pallas output mismatch vs JAX reference")
    print("KERNEL_OK")
</pallas_src>

<mosaic_0001>
module attributes {stable_mosaic.version = 11 : i64} {
  func.func @_qnet_kernel(%arg0: memref<1x512xf32, #tpu.memory_space<vmem>>, %arg1: memref<9x512xf32, #tpu.memory_space<vmem>>, %arg2: memref<16x16xf32, #tpu.memory_space<vmem>>, %arg3: memref<16x1xf32, #tpu.memory_space<vmem>>, %arg4: memref<32x144xf32, #tpu.memory_space<vmem>>, %arg5: memref<32x1xf32, #tpu.memory_space<vmem>>, %arg6: memref<512x2xf32, #tpu.memory_space<vmem>>, %arg7: memref<2x32xf32, #tpu.memory_space<vmem>>, %arg8: memref<2x32xf32, #tpu.memory_space<vmem>>, %arg9: memref<32x128xf32, #tpu.memory_space<vmem>>, %arg10: memref<32x128xf32, #tpu.memory_space<vmem>>, %arg11: memref<1x128xf32, #tpu.memory_space<vmem>>, %arg12: memref<32x4xf32, #tpu.memory_space<vmem>>, %arg13: memref<1x4xf32, #tpu.memory_space<vmem>>, %arg14: memref<2x128xf32, #tpu.memory_space<vmem>>, %arg15: memref<16x512xf32, #tpu.memory_space<vmem>>, %arg16: memref<144x512xf32, #tpu.memory_space<vmem>>) attributes {dimension_semantics = [], scalar_prefetch = 0 : i64, scratch_operands = 2 : i64, tpu.core_type = #tpu.core_type<tc>} {
    %c0 = arith.constant 0 : index
    %c0_0 = arith.constant 0 : index
    %0 = vector.load %arg0[%c0, %c0_0] : memref<1x512xf32, #tpu.memory_space<vmem>>, vector<1x512xf32>
    %cst = arith.constant 0.000000e+00 : f32
    %1 = vector.broadcast %cst : f32 to vector<16x512xf32>
    %c0_1 = arith.constant 0 : index
    %c0_2 = arith.constant 0 : index
    %2 = vector.load %arg15[%c0_1, %c0_2] : memref<16x512xf32, #tpu.memory_space<vmem>>, vector<16x512xf32>
    tpu.vector_store %arg15[%c0_1, %c0_2], %1 {strides = array<i32>} : memref<16x512xf32, #tpu.memory_space<vmem>>, vector<16x512xf32>,
    %c17_i32 = arith.constant 17 : i32
    %3 = tpu.dynamic_rotate %0 by %c17_i32 dim 1 : vector<1x512xf32>, i32 -> vector<1x512xf32>
    %c0_3 = arith.constant 0 : index
    %c0_4 = arith.constant 0 : index
    %4 = vector.load %arg1[%c0_3, %c0_4] : memref<9x512xf32, #tpu.memory_space<vmem>>, vector<1x512xf32>
    %5 = arith.mulf %3, %4 : vector<1x512xf32>
    %c0_5 = arith.constant 0 : index
    %c0_6 = arith.constant 0 : index
    %6 = vector.load %arg15[%c0_5, %c0_6] : memref<16x512xf32, #tpu.memory_space<vmem>>, vector<1x512xf32>
    tpu.vector_store %arg15[%c0_5, %c0_6], %5 {strides = array<i32>} : memref<16x512xf32, #tpu.memory_space<vmem>>, vector<1x512xf32>,
    %c16_i32 = arith.constant 16 : i32
    %7 = tpu.dynamic_rotate %0 by %c16_i32 dim 1 : vector<1x512xf32>, i32 -> vector<1x512xf32>
    %c1 = arith.constant 1 : index
    %c0_7 = arith.constant 0 : index
    %8 = vector.load %arg1[%c1, %c0_7] : memref<9x512xf32, #tpu.memory_space<vmem>>, vector<1x512xf32>
    %9 = arith.mulf %7, %8 : vector<1x512xf32>
    %c1_8 = arith.constant 1 : index
    %c0_9 = arith.constant 0 : index
    %10 = vector.load %arg15[%c1_8, %c0_9] : memref<16x512xf32, #tpu.memory_space<vmem>>, vector<1x512xf32>
    tpu.vector_store %arg15[%c1_8, %c0_9], %9 {strides = array<i32>} : memref<16x512xf32, #tpu.memory_space<vmem>>, vector<1x512xf32>,
    %c15_i32 = arith.constant 15 : i32
    %11 = tpu.dynamic_rotate %0 by %c15_i32 dim 1 : vector<1x512xf32>, i32 -> vector<1x512xf32>
    %c2 = arith.constant 2 : index
    %c0_10 = arith.constant 0 : index
    %12 = vector.load %arg1[%c2, %c0_10] : memref<9x512xf32, #tpu.memory_space<vmem>>, vector<1x512xf32>
    %13 = arith.mulf %11, %12 : vector<1x512xf32>
    %c2_11 = arith.constant 2 : index
    %c0_12 = arith.constant 0 : index
    %14 = vector.load %arg15[%c2_11, %c0_12] : memref<16x512xf32, #tpu.memory_space<vmem>>, vector<1x512xf32>
    tpu.vector_store %arg15[%c2_11, %c0_12], %13 {strides = array<i32>} : memref<16x512xf32, #tpu.memory_space<vmem>>, vector<1x512xf32>,
    %c1_i32 = arith.constant 1 : i32
    %15 = tpu.dynamic_rotate %0 by %c1_i32 dim 1 : vector<1x512xf32>, i32 -> vector<1x512xf32>
    %c3 = arith.constant 3 : index
    %c0_13 = arith.constant 0 : index
    %16 = vector.load %arg1[%c3, %c0_13] : memref<9x512xf32, #tpu.memory_space<vmem>>, vector<1x512xf32>
    %17 = arith.mulf %15, %16 : vector<1x512xf32>
    %c3_14 = arith.constant 3 : index
    %c0_15 = arith.constant 0 : index
    %18 = vector.load %arg15[%c3_14, %c0_15] : memref<16x512xf32, #tpu.memory_space<vmem>>, vector<1x512xf32>
    tpu.vector_store %arg15[%c3_14, %c0_15], %17 {strides = array<i32>} : memref<16x512xf32, #tpu.memory_space<vmem>>, vector<1x512xf32>,
    %c4 = arith.constant 4 : index
    %c0_16 = arith.constant 0 : index
    %19 = vector.load %arg15[%c4, %c0_16] : memref<16x512xf32, #tpu.memory_space<vmem>>, vector<1x512xf32>
    tpu.vector_store %arg15[%c4, %c0_16], %0 {strides = array<i32>} : memref<16x512xf32, #tpu.memory_space<vmem>>, vector<1x512xf32>,
    %c511_i32 = arith.constant 511 : i32
    %20 = tpu.dynamic_rotate %0 by %c511_i32 dim 1 : vector<1x512xf32>, i32 -> vector<1x512xf32>
    %c5 = arith.constant 5 : index
    %c0_17 = arith.constant 0 : index
    %21 = vector.load %arg1[%c5, %c0_17] : memref<9x512xf32, #tpu.memory_space<vmem>>, vector<1x512xf32>
    %22 = arith.mulf %20, %21 : vector<1x512xf32>
    %c5_18 = arith.constant 5 : index
    %c0_19 = arith.constant 0 : index
    %23 = vector.load %arg15[%c5_18, %c0_19] : memref<16x512xf32, #tpu.memory_space<vmem>>, vector<1x512xf32>
    tpu.vector_store %arg15[%c5_18, %c0_19], %22 {strides = array<i32>} : memref<16x512xf32, #tpu.memory_space<vmem>>, vector<1x512xf32>,
    %c497_i32 = arith.constant 497 : i32
    %24 = tpu.dynamic_rotate %0 by %c497_i32 dim 1 : vector<1x512xf32>, i32 -> vector<1x512xf32>
    %c6 = arith.constant 6 : index
    %c0_20 = arith.constant 0 : index
    %25 = vector.load %arg1[%c6, %c0_20] : memref<9x512xf32, #tpu.memory_space<vmem>>, vector<1x512xf32>
    %26 = arith.mulf %24, %25 : vector<1x512xf32>
    %c6_21 = arith.constant 6 : index
    %c0_22 = arith.constant 0 : index
    %27 = vector.load %arg15[%c6_21, %c0_22] : memref<16x512xf32, #tpu.memory_space<vmem>>, vector<1x512xf32>
    tpu.vector_store %arg15[%c6_21, %c0_22], %26 {strides = array<i32>} : memref<16x512xf32, #tpu.memory_space<vmem>>, vector<1x512xf32>,
    %c496_i32 = arith.constant 496 : i32
    %28 = tpu.dynamic_rotate %0 by %c496_i32 dim 1 : vector<1x512xf32>, i32 -> vector<1x512xf32>
    %c7 = arith.constant 7 : index
    %c0_23 = arith.constant 0 : index
    %29 = vector.load %arg1[%c7, %c0_23] : memref<9x512xf32, #tpu.memory_space<vmem>>, vector<1x512xf32>
    %30 = arith.mulf %28, %29 : vector<1x512xf32>
    %c7_24 = arith.constant 7 : index
    %c0_25 = arith.constant 0 : index
    %31 = vector.load %arg15[%c7_24, %c0_25] : memref<16x512xf32, #tpu.memory_space<vmem>>, vector<1x512xf32>
    tpu.vector_store %arg15[%c7_24, %c0_25], %30 {strides = array<i32>} : memref<16x512xf32, #tpu.memory_space<vmem>>, vector<1x512xf32>,
    %c495_i32 = arith.constant 495 : i32
    %32 = tpu.dynamic_rotate %0 by %c495_i32 dim 1 : vector<1x512xf32>, i32 -> vector<1x512xf32>
    %c8 = arith.constant 8 : index
    %c0_26 = arith.constant 0 : index
    %33 = vector.load %arg1[%c8, %c0_26] : memref<9x512xf32, #tpu.memory_space<vmem>>, vector<1x512xf32>
    %34 = arith.mulf %32, %33 : vector<1x512xf32>
    %c8_27 = arith.constant 8 : index
    %c0_28 = arith.constant 0 : index
    %35 = vector.load %arg15[%c8_27, %c0_28] : memref<16x512xf32, #tpu.memory_space<vmem>>, vector<1x512xf32>
    tpu.vector_store %arg15[%c8_27, %c0_28], %34 {strides = array<i32>} : memref<16x512xf32, #tpu.memory_space<vmem>>, vector<1x512xf32>,
    %c0_29 = arith.constant 0 : index
    %c0_30 = arith.constant 0 : index
    %36 = vector.load %arg2[%c0_29, %c0_30] : memref<16x16xf32, #tpu.memory_space<vmem>>, vector<16x16xf32>
    %c0_31 = arith.constant 0 : index
    %c0_32 = arith.constant 0 : index
    %37 = vector.load %arg15[%c0_31, %c0_32] : memref<16x512xf32, #tpu.memory_space<vmem>>, vector<16x512xf32>
    %cst_33 = arith.constant dense<0.000000e+00> : vector<16x512xf32>
    %38 = tpu.matmul %36, %37, %cst_33 {dimension_numbers = #tpu.dot_dimension_numbers<[1], [0], [0], [1], [0, 0, 1, 1], [], []>} : vector<16x16xf32>, vector<16x512xf32>, vector<16x512xf32> -> vector<16x512xf32>
    %c0_34 = arith.constant 0 : index
    %c0_35 = arith.constant 0 : index
    %39 = vector.load %arg3[%c0_34, %c0_35] : memref<16x1xf32, #tpu.memory_space<vmem>>, vector<16x1xf32>
    %40 = vector.broadcast %39 : vector<16x1xf32> to vector<16x512xf32>
    %41 = arith.addf %38, %40 : vector<16x512xf32>
    %cst_36 = arith.constant 0.000000e+00 : f32
    %42 = vector.broadcast %cst_36 : f32 to vector<16x512xf32>
    %43 = arith.maximumf %41, %42 : vector<16x512xf32>
    %c17_i32_37 = arith.constant 17 : i32
    %44 = tpu.dynamic_rotate %43 by %c17_i32_37 dim 1 : vector<16x512xf32>, i32 -> vector<16x512xf32>
    %c0_38 = arith.constant 0 : index
    %c0_39 = arith.constant 0 : index
    %45 = vector.load %arg1[%c0_38, %c0_39] : memref<9x512xf32, #tpu.memory_space<vmem>>, vector<1x512xf32>
    %46 = vector.broadcast %45 : vector<1x512xf32> to vector<16x512xf32>
    %47 = arith.mulf %44, %46 : vector<16x512xf32>
    %c0_40 = arith.constant 0 : index
    %c0_41 = arith.constant 0 : index
    %48 = vector.load %arg16[%c0_40, %c0_41] : memref<144x512xf32, #tpu.memory_space<vmem>>, vector<16x512xf32>
    tpu.vector_store %arg16[%c0_40, %c0_41], %47 {strides = array<i32>} : memref<144x512xf32, #tpu.memory_space<vmem>>, vector<16x512xf32>,
    %c16_i32_42 = arith.constant 16 : i32
    %49 = tpu.dynamic_rotate %43 by %c16_i32_42 dim 1 : vector<16x512xf32>, i32 -> vector<16x512xf32>
    %c1_43 = arith.constant 1 : index
    %c0_44 = arith.constant 0 : index
    %50 = vector.load %arg1[%c1_43, %c0_44] : memref<9x512xf32, #tpu.memory_space<vmem>>, vector<1x512xf32>
    %51 = vector.broadcast %50 : vector<1x512xf32> to vector<16x512xf32>
    %52 = arith.mulf %49, %51 : vector<16x512xf32>
    %c16 = arith.constant 16 : index
    %c0_45 = arith.constant 0 : index
    %53 = vector.load %arg16[%c16, %c0_45] : memref<144x512xf32, #tpu.memory_space<vmem>>, vector<16x512xf32>
    tpu.vector_store %arg16[%c16, %c0_45], %52 {strides = array<i32>} : memref<144x512xf32, #tpu.memory_space<vmem>>, vector<16x512xf32>,
    %c15_i32_46 = arith.constant 15 : i32
    %54 = tpu.dynamic_rotate %43 by %c15_i32_46 dim 1 : vector<16x512xf32>, i32 -> vector<16x512xf32>
    %c2_47 = arith.constant 2 : index
    %c0_48 = arith.constant 0 : index
    %55 = vector.load %arg1[%c2_47, %c0_48] : memref<9x512xf32, #tpu.memory_space<vmem>>, vector<1x512xf32>
    %56 = vector.broadcast %55 : vector<1x512xf32> to vector<16x512xf32>
    %57 = arith.mulf %54, %56 : vector<16x512xf32>
    %c32 = arith.constant 32 : index
    %c0_49 = arith.constant 0 : index
    %58 = vector.load %arg16[%c32, %c0_49] : memref<144x512xf32, #tpu.memory_space<vmem>>, vector<16x512xf32>
    tpu.vector_store %arg16[%c32, %c0_49], %57 {strides = array<i32>} : memref<144x512xf32, #tpu.memory_space<vmem>>, vector<16x512xf32>,
    %c1_i32_50 = arith.constant 1 : i32
    %59 = tpu.dynamic_rotate %43 by %c1_i32_50 dim 1 : vector<16x512xf32>, i32 -> vector<16x512xf32>
    %c3_51 = arith.constant 3 : index
    %c0_52 = arith.constant 0 : index
    %60 = vector.load %arg1[%c3_51, %c0_52] : memref<9x512xf32, #tpu.memory_space<vmem>>, vector<1x512xf32>
    %61 = vector.broadcast %60 : vector<1x512xf32> to vector<16x512xf32>
    %62 = arith.mulf %59, %61 : vector<16x512xf32>
    %c48 = arith.constant 48 : index
    %c0_53 = arith.constant 0 : index
    %63 = vector.load %arg16[%c48, %c0_53] : memref<144x512xf32, #tpu.memory_space<vmem>>, vector<16x512xf32>
    tpu.vector_store %arg16[%c48, %c0_53], %62 {strides = array<i32>} : memref<144x512xf32, #tpu.memory_space<vmem>>, vector<16x512xf32>,
    %c64 = arith.constant 64 : index
    %c0_54 = arith.constant 0 : index
    %64 = vector.load %arg16[%c64, %c0_54] : memref<144x512xf32, #tpu.memory_space<vmem>>, vector<16x512xf32>
    tpu.vector_store %arg16[%c64, %c0_54], %43 {strides = array<i32>} : memref<144x512xf32, #tpu.memory_space<vmem>>, vector<16x512xf32>,
    %c511_i32_55 = arith.constant 511 : i32
    %65 = tpu.dynamic_rotate %43 by %c511_i32_55 dim 1 : vector<16x512xf32>, i32 -> vector<16x512xf32>
    %c5_56 = arith.constant 5 : index
    %c0_57 = arith.constant 0 : index
    %66 = vector.load %arg1[%c5_56, %c0_57] : memref<9x512xf32, #tpu.memory_space<vmem>>, vector<1x512xf32>
    %67 = vector.broadcast %66 : vector<1x512xf32> to vector<16x512xf32>
    %68 = arith.mulf %65, %67 : vector<16x512xf32>
    %c80 = arith.constant 80 : index
    %c0_58 = arith.constant 0 : index
    %69 = vector.load %arg16[%c80, %c0_58] : memref<144x512xf32, #tpu.memory_space<vmem>>, vector<16x512xf32>
    tpu.vector_store %arg16[%c80, %c0_58], %68 {strides = array<i32>} : memref<144x512xf32, #tpu.memory_space<vmem>>, vector<16x512xf32>,
    %c497_i32_59 = arith.constant 497 : i32
    %70 = tpu.dynamic_rotate %43 by %c497_i32_59 dim 1 : vector<16x512xf32>, i32 -> vector<16x512xf32>
    %c6_60 = arith.constant 6 : index
    %c0_61 = arith.constant 0 : index
    %71 = vector.load %arg1[%c6_60, %c0_61] : memref<9x512xf32, #tpu.memory_space<vmem>>, vector<1x512xf32>
    %72 = vector.broadcast %71 : vector<1x512xf32> to vector<16x512xf32>
    %73 = arith.mulf %70, %72 : vector<16x512xf32>
    %c96 = arith.constant 96 : index
    %c0_62 = arith.constant 0 : index
    %74 = vector.load %arg16[%c96, %c0_62] : memref<144x512xf32, #tpu.memory_space<vmem>>, vector<16x512xf32>
    tpu.vector_store %arg16[%c96, %c0_62], %73 {strides = array<i32>} : memref<144x512xf32, #tpu.memory_space<vmem>>, vector<16x512xf32>,
    %c496_i32_63 = arith.constant 496 : i32
    %75 = tpu.dynamic_rotate %43 by %c496_i32_63 dim 1 : vector<16x512xf32>, i32 -> vector<16x512xf32>
    %c7_64 = arith.constant 7 : index
    %c0_65 = arith.constant 0 : index
    %76 = vector.load %arg1[%c7_64, %c0_65] : memref<9x512xf32, #tpu.memory_space<vmem>>, vector<1x512xf32>
    %77 = vector.broadcast %76 : vector<1x512xf32> to vector<16x512xf32>
    %78 = arith.mulf %75, %77 : vector<16x512xf32>
    %c112 = arith.constant 112 : index
    %c0_66 = arith.constant 0 : index
    %79 = vector.load %arg16[%c112, %c0_66] : memref<144x512xf32, #tpu.memory_space<vmem>>, vector<16x512xf32>
    tpu.vector_store %arg16[%c112, %c0_66], %78 {strides = array<i32>} : memref<144x512xf32, #tpu.memory_space<vmem>>, vector<16x512xf32>,
    %c495_i32_67 = arith.constant 495 : i32
    %80 = tpu.dynamic_rotate %43 by %c495_i32_67 dim 1 : vector<16x512xf32>, i32 -> vector<16x512xf32>
    %c8_68 = arith.constant 8 : index
    %c0_69 = arith.constant 0 : index
    %81 = vector.load %arg1[%c8_68, %c0_69] : memref<9x512xf32, #tpu.memory_space<vmem>>, vector<1x512xf32>
    %82 = vector.broadcast %81 : vector<1x512xf32> to vector<16x512xf32>
    %83 = arith.mulf %80, %82 : vector<16x512xf32>
    %c128 = arith.constant 128 : index
    %c0_70 = arith.constant 0 : index
    %84 = vector.load %arg16[%c128, %c0_70] : memref<144x512xf32, #tpu.memory_space<vmem>>, vector<16x512xf32>
    tpu.vector_store %arg16[%c128, %c0_70], %83 {strides = array<i32>} : memref<144x512xf32, #tpu.memory_space<vmem>>, vector<16x512xf32>,
    %c0_71 = arith.constant 0 : index
    %c0_72 = arith.constant 0 : index
    %85 = vector.load %arg4[%c0_71, %c0_72] : memref<32x144xf32, #tpu.memory_space<vmem>>, vector<32x144xf32>
    %c0_73 = arith.constant 0 : index
    %c0_74 = arith.constant 0 : index
    %86 = vector.load %arg16[%c0_73, %c0_74] : memref<144x512xf32, #tpu.memory_space<vmem>>, vector<144x512xf32>
    %cst_75 = arith.constant dense<0.000000e+00> : vector<32x512xf32>
    %87 = tpu.matmul %85, %86, %cst_75 {dimension_numbers = #tpu.dot_dimension_numbers<[1], [0], [0], [1], [0, 0, 1, 1], [], []>} : vector<32x144xf32>, vector<144x512xf32>, vector<32x512xf32> -> vector<32x512xf32>
    %c0_76 = arith.constant 0 : index
    %c0_77 = arith.constant 0 : index
    %88 = vector.load %arg5[%c0_76, %c0_77] : memref<32x1xf32, #tpu.memory_space<vmem>>, vector<32x1xf32>
    %89 = vector.broadcast %88 : vector<32x1xf32> to vector<32x512xf32>
    %90 = arith.addf %87, %89 : vector<32x512xf32>
    %cst_78 = arith.constant 0.000000e+00 : f32
    %91 = vector.broadcast %cst_78 : f32 to vector<32x512xf32>
    %92 = arith.maximumf %90, %91 : vector<32x512xf32>
    %c0_79 = arith.constant 0 : index
    %c0_80 = arith.constant 0 : index
    %93 = vector.load %arg6[%c0_79, %c0_80] : memref<512x2xf32, #tpu.memory_space<vmem>>, vector<512x2xf32>
    %cst_81 = arith.constant dense<0.000000e+00> : vector<32x2xf32>
    %94 = tpu.matmul %92, %93, %cst_81 {dimension_numbers = #tpu.dot_dimension_numbers<[1], [0], [0], [1], [0, 0, 1, 1], [], []>} : vector<32x512xf32>, vector<512x2xf32>, vector<32x2xf32> -> vector<32x2xf32>
    %95 = tpu.transpose %94, [1, 0] : vector<32x2xf32> -> vector<2x32xf32>
    %c0_82 = arith.constant 0 : index
    %c0_83 = arith.constant 0 : index
    %96 = vector.load %arg9[%c0_82, %c0_83] : memref<32x128xf32, #tpu.memory_space<vmem>>, vector<32x128xf32>
    %cst_84 = arith.constant dense<0.000000e+00> : vector<2x128xf32>
    %97 = tpu.matmul %95, %96, %cst_84 {dimension_numbers = #tpu.dot_dimension_numbers<[1], [0], [0], [1], [0, 0, 1, 1], [], []>} : vector<2x32xf32>, vector<32x128xf32>, vector<2x128xf32> -> vector<2x128xf32>
    %c0_85 = arith.constant 0 : index
    %c0_86 = arith.constant 0 : index
    %98 = vector.load %arg7[%c0_85, %c0_86] : memref<2x32xf32, #tpu.memory_space<vmem>>, vector<2x32xf32>
    %c0_87 = arith.constant 0 : index
    %c0_88 = arith.constant 0 : index
    %99 = vector.load %arg10[%c0_87, %c0_88] : memref<32x128xf32, #tpu.memory_space<vmem>>, vector<32x128xf32>
    %cst_89 = arith.constant dense<0.000000e+00> : vector<2x128xf32>
    %100 = tpu.matmul %98, %99, %cst_89 {dimension_numbers = #tpu.dot_dimension_numbers<[1], [0], [0], [1], [0, 0, 1, 1], [], []>} : vector<2x32xf32>, vector<32x128xf32>, vector<2x128xf32> -> vector<2x128xf32>
    %101 = arith.addf %97, %100 : vector<2x128xf32>
    %c0_90 = arith.constant 0 : index
    %c0_91 = arith.constant 0 : index
    %102 = vector.load %arg11[%c0_90, %c0_91] : memref<1x128xf32, #tpu.memory_space<vmem>>, vector<1x128xf32>
    %103 = vector.broadcast %102 : vector<1x128xf32> to vector<2x128xf32>
    %104 = arith.addf %101, %103 : vector<2x128xf32>
    %105 = vector.extract_strided_slice %104 {offsets = [0, 0], sizes = [2, 32], strides = [1, 1]} : vector<2x128xf32> to vector<2x32xf32>
    %106 = arith.negf %105 : vector<2x32xf32>
    %107 = math.exp %106 : vector<2x32xf32>
    %cst_92 = arith.constant 1.000000e+00 : f32
    %108 = vector.broadcast %cst_92 : f32 to vector<2x32xf32>
    %109 = arith.addf %108, %107 : vector<2x32xf32>
    %110 = arith.divf %108, %109 : vector<2x32xf32>
    %111 = vector.extract_strided_slice %104 {offsets = [0, 32], sizes = [2, 32], strides = [1, 1]} : vector<2x128xf32> to vector<2x32xf32>
    %112 = arith.negf %111 : vector<2x32xf32>
    %113 = math.exp %112 : vector<2x32xf32>
    %cst_93 = arith.constant 1.000000e+00 : f32
    %114 = vector.broadcast %cst_93 : f32 to vector<2x32xf32>
    %115 = arith.addf %114, %113 : vector<2x32xf32>
    %116 = arith.divf %114, %115 : vector<2x32xf32>
    %117 = vector.extract_strided_slice %104 {offsets = [0, 64], sizes = [2, 32], strides = [1, 1]} : vector<2x128xf32> to vector<2x32xf32>
    %118 = math.tanh %117 : vector<2x32xf32>
    %119 = vector.extract_strided_slice %104 {offsets = [0, 96], sizes = [2, 32], strides = [1, 1]} : vector<2x128xf32> to vector<2x32xf32>
    %120 = arith.negf %119 : vector<2x32xf32>
    %121 = math.exp %120 : vector<2x32xf32>
    %cst_94 = arith.constant 1.000000e+00 : f32
    %122 = vector.broadcast %cst_94 : f32 to vector<2x32xf32>
    %123 = arith.addf %122, %121 : vector<2x32xf32>
    %124 = arith.divf %122, %123 : vector<2x32xf32>
    %c0_95 = arith.constant 0 : index
    %c0_96 = arith.constant 0 : index
    %125 = vector.load %arg8[%c0_95, %c0_96] : memref<2x32xf32, #tpu.memory_space<vmem>>, vector<2x32xf32>
    %126 = arith.mulf %116, %125 : vector<2x32xf32>
    %127 = arith.mulf %110, %118 : vector<2x32xf32>
    %128 = arith.addf %126, %127 : vector<2x32xf32>
    %129 = math.tanh %128 : vector<2x32xf32>
    %130 = arith.mulf %124, %129 : vector<2x32xf32>
    %c0_97 = arith.constant 0 : index
    %c0_98 = arith.constant 0 : index
    %131 = vector.load %arg12[%c0_97, %c0_98] : memref<32x4xf32, #tpu.memory_space<vmem>>, vector<32x4xf32>
    %cst_99 = arith.constant dense<0.000000e+00> : vector<2x4xf32>
    %132 = tpu.matmul %130, %131, %cst_99 {dimension_numbers = #tpu.dot_dimension_numbers<[1], [0], [0], [1], [0, 0, 1, 1], [], []>} : vector<2x32xf32>, vector<32x4xf32>, vector<2x4xf32> -> vector<2x4xf32>
    %c0_100 = arith.constant 0 : index
    %c0_101 = arith.constant 0 : index
    %133 = vector.load %arg13[%c0_100, %c0_101] : memref<1x4xf32, #tpu.memory_space<vmem>>, vector<1x4xf32>
    %134 = vector.broadcast %133 : vector<1x4xf32> to vector<2x4xf32>
    %135 = arith.addf %132, %134 : vector<2x4xf32>
    %cst_102 = arith.constant 0.000000e+00 : f32
    %136 = vector.broadcast %cst_102 : f32 to vector<2x128xf32>
    %c0_103 = arith.constant 0 : index
    %c0_104 = arith.constant 0 : index
    %137 = vector.load %arg14[%c0_103, %c0_104] : memref<2x128xf32, #tpu.memory_space<vmem>>, vector<2x128xf32>
    tpu.vector_store %arg14[%c0_103, %c0_104], %136 {strides = array<i32>} : memref<2x128xf32, #tpu.memory_space<vmem>>, vector<2x128xf32>,
    %c0_105 = arith.constant 0 : index
    %c0_106 = arith.constant 0 : index
    %138 = vector.load %arg14[%c0_105, %c0_106] : memref<2x128xf32, #tpu.memory_space<vmem>>, vector<2x4xf32>
    tpu.vector_store %arg14[%c0_105, %c0_106], %135 {strides = array<i32>} : memref<2x128xf32, #tpu.memory_space<vmem>>, vector<2x4xf32>,
    %c0_107 = arith.constant 0 : index
    %c4_108 = arith.constant 4 : index
    %139 = vector.load %arg14[%c0_107, %c4_108] : memref<2x128xf32, #tpu.memory_space<vmem>>, vector<2x32xf32>
    tpu.vector_store %arg14[%c0_107, %c4_108], %130 {strides = array<i32>} : memref<2x128xf32, #tpu.memory_space<vmem>>, vector<2x32xf32>,
    %c0_109 = arith.constant 0 : index
    %c36 = arith.constant 36 : index
    %140 = vector.load %arg14[%c0_109, %c36] : memref<2x128xf32, #tpu.memory_space<vmem>>, vector<2x32xf32>
    tpu.vector_store %arg14[%c0_109, %c36], %128 {strides = array<i32>} : memref<2x128xf32, #tpu.memory_space<vmem>>, vector<2x32xf32>,
    return
  }
}

</mosaic_0001>

<bundles_post_ra>
// kernel: qnetwork_forward.1
= control target key start
LH: loop header
LB: loop body
LE: loop exit
PB: predicated region body
PF: predicated region fallthrough
CT: control target
= control target key end

     0   :  { %v57_v0 = vlaneseq  ;;  %v3740_v1 = vmov 0.0   ;;  %s2587_s15 = smov 16   ;;  %s2588_s16 = smov 15   ;;  %v2594_v13 = vmov 0   ;;  %v2595_v16 = vmov 1966171168   ;;  %s3725_s0 = inlined_call_operand.vmem [shape: f32[1,512], index: 0, kind: input, shape index: {}]   ;;  %s3726_s3 = inlined_call_operand.vmem [shape: f32[16,1], index: 3, kind: input, shape index: {}]   ;;  %s3727_s1 = inlined_call_operand.vmem [shape: f32[9,512], index: 1, kind: input, shape index: {}]   ;;  %s3728_s2 = inlined_call_operand.vmem [shape: f32[16,16], index: 2, kind: input, shape index: {}]   ;;  %s3729_s4 = inlined_call_operand.vmem [shape: f32[32,144], index: 4, kind: input, shape index: {}]   ;;  %s3730_s5 = inlined_call_operand.vmem [shape: f32[32,1], index: 5, kind: input, shape index: {}]   ;;  %s3731_s6 = inlined_call_operand.vmem [shape: f32[512,2], index: 6, kind: input, shape index: {}]   ;;  %s3732_s10 = inlined_call_operand.vmem [shape: f32[32,128], index: 10, kind: input, shape index: {}]   ;;  %s3733_s9 = inlined_call_operand.vmem [shape: f32[32,128], index: 9, kind: input, shape index: {}]   ;;  %s3734_s7 = inlined_call_operand.vmem [shape: f32[2,32], index: 7, kind: input, shape index: {}]   ;;  %s3735_s11 = inlined_call_operand.vmem [shape: f32[1,128], index: 11, kind: input, shape index: {}]   ;;  %s3736_s8 = inlined_call_operand.vmem [shape: f32[2,32], index: 8, kind: input, shape index: {}]   ;;  %s3737_s12 = inlined_call_operand.vmem [shape: f32[32,4], index: 12, kind: input, shape index: {}]   ;;  %s3738_s14 = inlined_call_operand.vmem [shape: f32[2,128], index: 14, kind: output, shape index: {}]   ;;  %s3739_s13 = inlined_call_operand.vmem [shape: f32[1,4], index: 13, kind: input, shape index: {}]  }
   0x1   :  { %48 = vst [vmem:[#allocation2] sm:$0xff] %v3740_v1  ;;  %49 = vst [vmem:[#allocation2 + $0x8] sm:$0xff] %v3740_v1  ;;  %753 = vmatprep.mubr.f32.mxu0 %v3740_v1  ;;  %830 = vmatprep.mubr.f32.mxu1 %v3740_v1  ;;  %v47_v2 = vld [vmem:[%s3725_s0] sm:$0xf]  ;;  %s2586_s0 = smov 17   ;;  %s2589_s17 = smov 1   ;;  %v125_v17 = vunpack.c.l.s4 %v2595_v16 }
   0x2   :  { %50 = vst [vmem:[#allocation2 + $0x10] sm:$0xff] %v3740_v1  ;;  %51 = vst [vmem:[#allocation2 + $0x18] sm:$0xff] %v3740_v1  ;;  %v2691_v3 = vshrl.u32 %v57_v0, 7  ;;  %vm2694_vm0 = vcmp.lt.s32.totalorder %v57_v0, 512  ;;  %s2590_s18 = smov 127   ;;  %s2591_s19 = smov 113   ;;  %2575 = vset.pattern.permute.xlu0 %v2594_v13  ;;  %2576 = vset.pattern.permute.xlu1 %v2594_v13 }
   0x3   :  { %52 = vst [vmem:[#allocation2 + $0x20] sm:$0xff] %v3740_v1  ;;  %53 = vst [vmem:[#allocation2 + $0x28] sm:$0xff] %v3740_v1  ;;  %s2592_s20 = smov 112   ;;  %s2593_s21 = smov 111   ;;  %v670_v14 = vld [vmem:[%s3726_s3] sm:$0xff]  ;;  %v671_v15 = vld [vmem:[%s3726_s3 + $0x8] sm:$0xff]  ;;  %v126_v20 = vunpack.c.0.s8 %v125_v17 }
   0x4   :  { %54 = vst [vmem:[#allocation2 + $0x30] sm:$0xff] %v3740_v1  ;;  %55 = vst [vmem:[#allocation2 + $0x38] sm:$0xff] %v3740_v1  ;;  %v2701_v5 = vsub.s32 2, %v2691_v3  ;;  %v2704_v6 = vsub.s32 0, %v2691_v3  ;;  %v2707_v7 = vsub.s32 3, %v2691_v3  ;;  %v2710_v8 = vsub.s32 1, %v2691_v3 }
   0x5   :  { %370 = vst.msk [vmem:[#allocation2 + $0x4] ss:$8 sm:$0xf] %vm2694_vm0, %v47_v2  ;;  %v2755_v18 = vand.u32 127, %v57_v0  ;;  %v2766_v27 = vsub.s32 %v126_v20, %v2691_v3  ;;  %v660_v4 = vld [vmem:[%s3728_s2] sm:$0xff]  ;;  %vm682_vm9 = vcmask 130048  }
   0x6   :  { %v68_v9 = vrot.slane %v47_v2, %v2701_v5  ;;  %v60_v10 = vrot.slane %v47_v2, %v2704_v6  ;;  %v72_v11 = vrot.slane %v47_v2, %v2707_v7  ;;  %v64_v12 = vrot.slane %v47_v2, %v2710_v8  ;;  %v92_v19 = vld [vmem:[%s3727_s1] ss:$8 sm:$0xf]  ;;  %v2228_v38 = vld [vmem:[%s3727_s1 + $0x1] ss:$8 sm:$0xf] }
   0x7   :  { %vm87_vm1 = vcmp.lt.s32.totalorder %v2755_v18, 17  ;;  %v97_v23 = vrot.slane %v92_v19, %v2704_v6  ;;  %v109_v24 = vrot.slane %v92_v19, %v2707_v7  ;;  %v101_v25 = vrot.slane %v92_v19, %v2710_v8  ;;  %v2229_v61 = vld [vmem:[%s3727_s1 + $0x2] ss:$8 sm:$0xf]  ;;  %s2598_s3 = smov 64   ;;  %s2599_s30 = smov 32  }
   0x8   :  { %81 = vrot.lane.b32.xlu1 %v68_v9, %s2586_s0  ;;  %77 = vrot.lane.b32.xlu0 %v60_v10, %s2586_s0  ;;  %v105_v26 = vrot.slane %v92_v19, %v2701_v5  ;;  %vm161_vm2 = vcmp.lt.s32.totalorder %v2755_v18, 16  ;;  %v176_v43 = vrot.slane %v2228_v38, %v2710_v8  ;;  %v172_v44 = vrot.slane %v2228_v38, %v2704_v6 }
   0x9   :  { %v180_v45 = vrot.slane %v2228_v38, %v2701_v5  ;;  %v184_v49 = vrot.slane %v2228_v38, %v2707_v7  ;;  %vm233_vm3 = vcmp.lt.s32.totalorder %v2755_v18, 15  ;;  %v248_v3 = vrot.slane %v2229_v61, %v2710_v8 }
   0xa   :  { %vm305_vm4 = vcmp.lt.s32.totalorder %v2755_v18, 1  ;;  %vm380_vm5 = vcmp.lt.s32.totalorder %v2755_v18, 127  ;;  %vm452_vm6 = vcmp.lt.s32.totalorder %v2755_v18, 113  ;;  %vm524_vm7 = vcmp.lt.s32.totalorder %v2755_v18, 112 }
   0xb   :  { %vm596_vm8 = vcmp.lt.s32.totalorder %v2755_v18, 111  ;;  %v1683_v18 = vld [vmem:[%s3731_s6 + $0x90] sm:$0xff]  ;;  %vm2597_vm10 = vmmov 0   ;;  %vm1940_vm11 = vcmask 261120   ;;  %vm2211_vm12 = vcmask 25600  }
   0xc   :  { %83 = vrot.lane.b32.xlu1 %v72_v11, %s2586_s0  ;;  %79 = vrot.lane.b32.xlu0 %v64_v12, %s2586_s0  ;;  %vm2216_vm13 = vcmask 287776   ;;  %vm2222_vm14 = vcmask 550176  }
  0x10   :  { %155 = vrot.lane.b32.xlu1 %v64_v12, %s2587_s15  ;;  %153 = vrot.lane.b32.xlu0 %v60_v10, %s2587_s15 }
  0x14   :  { %159 = vrot.lane.b32.xlu1 %v72_v11, %s2587_s15  ;;  %157 = vrot.lane.b32.xlu0 %v68_v9, %s2587_s15 }
  0x18   :  { %227 = vrot.lane.b32.xlu1 %v64_v12, %s2588_s16  ;;  %225 = vrot.lane.b32.xlu0 %v60_v10, %s2588_s16 }
  0x1c   :  { %231 = vrot.lane.b32.xlu1 %v72_v11, %s2588_s16  ;;  %229 = vrot.lane.b32.xlu0 %v68_v9, %s2588_s16 }
  0x20   :  { %299 = vrot.lane.b32.xlu1 %v64_v12, %s2589_s17  ;;  %297 = vrot.lane.b32.xlu0 %v60_v10, %s2589_s17 }
  0x24   :  { %303 = vrot.lane.b32.xlu1 %v72_v11, %s2589_s17  ;;  %301 = vrot.lane.b32.xlu0 %v68_v9, %s2589_s17 }
  0x28   :  { %374 = vrot.lane.b32.xlu1 %v64_v12, %s2590_s18  ;;  %372 = vrot.lane.b32.xlu0 %v60_v10, %s2590_s18 }
  0x2c   :  { %378 = vrot.lane.b32.xlu1 %v72_v11, %s2590_s18  ;;  %376 = vrot.lane.b32.xlu0 %v68_v9, %s2590_s18 }
  0x30   :  { %446 = vrot.lane.b32.xlu1 %v64_v12, %s2591_s19  ;;  %444 = vrot.lane.b32.xlu0 %v60_v10, %s2591_s19 }
  0x34   :  { %450 = vrot.lane.b32.xlu1 %v72_v11, %s2591_s19  ;;  %448 = vrot.lane.b32.xlu0 %v68_v9, %s2591_s19 }
  0x38   :  { %518 = vrot.lane.b32.xlu1 %v64_v12, %s2592_s20  ;;  %516 = vrot.lane.b32.xlu0 %v60_v10, %s2592_s20 }
  0x3c   :  { %522 = vrot.lane.b32.xlu1 %v72_v11, %s2592_s20  ;;  %520 = vrot.lane.b32.xlu0 %v68_v9, %s2592_s20 }
  0x40   :  { %590 = vrot.lane.b32.xlu1 %v64_v12, %s2593_s21  ;;  %588 = vrot.lane.b32.xlu0 %v60_v10, %s2593_s21  ;;  %v252_v10 = vrot.slane %v2229_v61, %v2701_v5 }
  0x44   :  { %594 = vrot.lane.b32.xlu1 %v72_v11, %s2593_s21  ;;  %592 = vrot.lane.b32.xlu0 %v68_v9, %s2593_s21  ;;  %v244_v9 = vrot.slane %v2229_v61, %v2704_v6 }
  0x48   :  { %674 = vperm.xlu0 %2575, %v670_v14   ;;  %679 = vperm.xlu1 %2576, %v671_v15   ;;  %v256_v14 = vrot.slane %v2229_v61, %v2707_v7 }
  0x7a   :  { %v82_v21 = vpop.permute.xlu1 %81  ;;  %v78_v22 = vpop.permute.xlu0 %77 }
  0x7e   :  { %v84_v28 = vpop.permute.xlu1 %83  ;;  %v80_v29 = vpop.permute.xlu0 %79 }
  0x7f   :  { %v88_v30 = vsel %vm87_vm1, %v82_v21, %v84_v28  ;;  %v91_v31 = vsel %vm87_vm1, %v84_v28, %v78_v22  ;;  %v89_v32 = vsel %vm87_vm1, %v80_v29, %v82_v21  ;;  %v90_v33 = vsel %vm87_vm1, %v78_v22, %v80_v29  ;;  %v2230_v28 = vld [vmem:[%s3727_s1 + $0x3] ss:$8 sm:$0xf] }
  0x80   :  { %v114_v34 = vmul.f32 %v97_v23, %v91_v31  ;;  %v117_v35 = vmul.f32 %v109_v24, %v88_v30  ;;  %v115_v36 = vmul.f32 %v101_v25, %v90_v33  ;;  %v116_v37 = vmul.f32 %v105_v26, %v89_v32 }
  0x81   :  { %v320_v33 = vrot.slane %v2230_v28, %v2710_v8 }
  0x82   :  { %v122_v39 = vcombine.low %v114_v34, %v115_v36  ;;  %v123_v40 = vcombine.low %v116_v37, %v117_v35  ;;  %v156_v41 = vpop.permute.xlu1 %155  ;;  %v154_v42 = vpop.permute.xlu0 %153  ;;  %v316_v34 = vrot.slane %v2230_v28, %v2704_v6  ;;  %v324_v35 = vrot.slane %v2230_v28, %v2701_v5 }
  0x83   :  { %v164_v48 = vsel %vm161_vm2, %v154_v42, %v156_v41 }
  0x84   :  { %v130_v46 = vrot.slane %v122_v39, %v2766_v27  ;;  %v137_v47 = vrot.slane %v123_v40, %v2766_v27  ;;  %v190_v53 = vmul.f32 %v176_v43, %v164_v48  ;;  %v328_v39 = vrot.slane %v2230_v28, %v2707_v7 }
  0x86   :  { %v138_v50 = vcombine.low %v130_v46, %v137_v47  ;;  %v160_v51 = vpop.permute.xlu1 %159  ;;  %v158_v52 = vpop.permute.xlu0 %157 }
  0x87   :  { %v165_v54 = vsel %vm161_vm2, %v160_v51, %v154_v42  ;;  %v162_v55 = vsel %vm161_vm2, %v158_v52, %v160_v51  ;;  %v163_v56 = vsel %vm161_vm2, %v156_v41, %v158_v52  ;;  %v2231_v51 = vld [vmem:[%s3727_s1 + $0x5] ss:$8 sm:$0xf] }
  0x88   :  { %v145_v57 = vrot.slane %v138_v50, %v2766_v27  ;;  %v189_v58 = vmul.f32 %v172_v44, %v165_v54  ;;  %v191_v59 = vmul.f32 %v180_v45, %v163_v56  ;;  %v192_v60 = vmul.f32 %v184_v49, %v162_v55 }
  0x89   :  { %v391_v56 = vrot.slane %v2231_v51, %v2704_v6 }
  0x8a   :  { %151 = vst.msk [vmem:[#allocation2] ss:$8 sm:$0xf] %vm2694_vm0, %v145_v57  ;;  %v197_v62 = vcombine.low %v189_v58, %v190_v53  ;;  %v198_v63 = vcombine.low %v191_v59, %v192_v60  ;;  %v228_v0 = vpop.permute.xlu1 %227  ;;  %v226_v2 = vpop.permute.xlu0 %225  ;;  %v403_v57 = vrot.slane %v2231_v51, %v2707_v7  ;;  %v395_v58 = vrot.slane %v2231_v51, %v2710_v8 }
  0x8b   :  { %v236_v13 = vsel %vm233_vm3, %v226_v2, %v228_v0 }
  0x8c   :  { %v205_v11 = vrot.slane %v197_v62, %v2766_v27  ;;  %v212_v12 = vrot.slane %v198_v63, %v2766_v27  ;;  %v262_v19 = vmul.f32 %v248_v3, %v236_v13  ;;  %v399_v62 = vrot.slane %v2231_v51, %v2701_v5 }
  0x8e   :  { %v213_v15 = vcombine.low %v205_v11, %v212_v12  ;;  %v232_v16 = vpop.permute.xlu1 %231  ;;  %v230_v17 = vpop.permute.xlu0 %229 }
  0x8f   :  { %v237_v20 = vsel %vm233_vm3, %v232_v16, %v226_v2  ;;  %v234_v21 = vsel %vm233_vm3, %v230_v17, %v232_v16  ;;  %v235_v22 = vsel %vm233_vm3, %v228_v0, %v230_v17  ;;  %v2232_v16 = vld [vmem:[%s3727_s1 + $0x6] ss:$8 sm:$0xf] }
  0x90   :  { %v220_v23 = vrot.slane %v213_v15, %v2766_v27  ;;  %v261_v24 = vmul.f32 %v244_v9, %v237_v20  ;;  %v263_v25 = vmul.f32 %v252_v10, %v235_v22  ;;  %v264_v26 = vmul.f32 %v256_v14, %v234_v21 }
  0x91   :  { %v463_v22 = vrot.slane %v2232_v16, %v2704_v6 }
  0x92   :  { %223 = vst.msk [vmem:[#allocation2 + $0x1] ss:$8 sm:$0xf] %vm2694_vm0, %v220_v23  ;;  %v269_v29 = vcombine.low %v261_v24, %v262_v19  ;;  %v270_v30 = vcombine.low %v263_v25, %v264_v26  ;;  %v300_v31 = vpop.permute.xlu1 %299  ;;  %v298_v32 = vpop.permute.xlu0 %297  ;;  %v475_v23 = vrot.slane %v2232_v16, %v2707_v7  ;;  %v467_v24 = vrot.slane %v2232_v16, %v2710_v8 }
  0x93   :  { %v308_v38 = vsel %vm305_vm4, %v298_v32, %v300_v31 }
  0x94   :  { %v277_v36 = vrot.slane %v269_v29, %v2766_v27  ;;  %v284_v37 = vrot.slane %v270_v30, %v2766_v27  ;;  %v334_v43 = vmul.f32 %v320_v33, %v308_v38  ;;  %v471_v29 = vrot.slane %v2232_v16, %v2701_v5 }
  0x96   :  { %v285_v40 = vcombine.low %v277_v36, %v284_v37  ;;  %v304_v41 = vpop.permute.xlu1 %303  ;;  %v302_v42 = vpop.permute.xlu0 %301 }
  0x97   :  { %v309_v44 = vsel %vm305_vm4, %v304_v41, %v298_v32  ;;  %v306_v45 = vsel %vm305_vm4, %v302_v42, %v304_v41  ;;  %v307_v46 = vsel %vm305_vm4, %v300_v31, %v302_v42  ;;  %v2233_v41 = vld [vmem:[%s3727_s1 + $0x7] ss:$8 sm:$0xf] }
  0x98   :  { %v292_v47 = vrot.slane %v285_v40, %v2766_v27  ;;  %v333_v48 = vmul.f32 %v316_v34, %v309_v44  ;;  %v335_v49 = vmul.f32 %v324_v35, %v307_v46  ;;  %v336_v50 = vmul.f32 %v328_v39, %v306_v45 }
  0x99   :  { %v535_v46 = vrot.slane %v2233_v41, %v2704_v6 }
  0x9a   :  { %295 = vst.msk [vmem:[#allocation2 + $0x2] ss:$8 sm:$0xf] %vm2694_vm0, %v292_v47  ;;  %v341_v52 = vcombine.low %v333_v48, %v334_v43  ;;  %v342_v53 = vcombine.low %v335_v49, %v336_v50  ;;  %v375_v54 = vpop.permute.xlu1 %374  ;;  %v373_v55 = vpop.permute.xlu0 %372  ;;  %v547_v47 = vrot.slane %v2233_v41, %v2707_v7  ;;  %v539_v48 = vrot.slane %v2233_v41, %v2710_v8 }
  0x9b   :  { %v383_v61 = vsel %vm380_vm5, %v373_v55, %v375_v54 }
  0x9c   :  { %v349_v59 = vrot.slane %v341_v52, %v2766_v27  ;;  %v356_v60 = vrot.slane %v342_v53, %v2766_v27  ;;  %v408_v3 = vmul.f32 %v391_v56, %v383_v61  ;;  %v543_v52 = vrot.slane %v2233_v41, %v2701_v5 }
  0x9e   :  { %v357_v63 = vcombine.low %v349_v59, %v356_v60  ;;  %v379_v0 = vpop.permute.xlu1 %378  ;;  %v377_v2 = vpop.permute.xlu0 %376 }
  0x9f   :  { %v384_v9 = vsel %vm380_vm5, %v379_v0, %v373_v55  ;;  %v381_v10 = vsel %vm380_vm5, %v377_v2, %v379_v0  ;;  %v382_v11 = vsel %vm380_vm5, %v375_v54, %v377_v2  ;;  %v2234_v0 = vld [vmem:[%s3727_s1 + $0x20] ss:$8 sm:$0xf] }
  0xa0   :  { %v364_v12 = vrot.slane %v357_v63, %v2766_v27  ;;  %v411_v13 = vmul.f32 %v403_v57, %v384_v9  ;;  %v409_v14 = vmul.f32 %v395_v58, %v382_v11  ;;  %v410_v15 = vmul.f32 %v399_v62, %v381_v10 }
  0xa1   :  { %v607_v11 = vrot.slane %v2234_v0, %v2704_v6 }
  0xa2   :  { %367 = vst.msk [vmem:[#allocation2 + $0x3] ss:$8 sm:$0xf] %vm2694_vm0, %v364_v12  ;;  %v416_v17 = vcombine.low %v408_v3, %v409_v14  ;;  %v417_v19 = vcombine.low %v410_v15, %v411_v13  ;;  %v447_v20 = vpop.permute.xlu1 %446  ;;  %v445_v21 = vpop.permute.xlu0 %444  ;;  %v619_v12 = vrot.slane %v2234_v0, %v2707_v7  ;;  %v611_v13 = vrot.slane %v2234_v0, %v2710_v8 }
  0xa3   :  { %v455_v28 = vsel %vm452_vm6, %v445_v21, %v447_v20 }
  0xa4   :  { %v424_v25 = vrot.slane %v416_v17, %v2766_v27  ;;  %v431_v26 = vrot.slane %v417_v19, %v2766_v27  ;;  %v480_v33 = vmul.f32 %v463_v22, %v455_v28  ;;  %v615_v17 = vrot.slane %v2234_v0, %v2701_v5 }
  0xa6   :  { %v432_v30 = vcombine.low %v424_v25, %v431_v26  ;;  %v451_v31 = vpop.permute.xlu1 %450  ;;  %v449_v32 = vpop.permute.xlu0 %448 }
  0xa7   :  { %v456_v34 = vsel %vm452_vm6, %v451_v31, %v445_v21  ;;  %v453_v35 = vsel %vm452_vm6, %v449_v32, %v451_v31  ;;  %v454_v36 = vsel %vm452_vm6, %v447_v20, %v449_v32 }
  0xa8   :  { %v439_v37 = vrot.slane %v432_v30, %v2766_v27  ;;  %v483_v38 = vmul.f32 %v475_v23, %v456_v34  ;;  %v481_v39 = vmul.f32 %v467_v24, %v454_v36  ;;  %v482_v40 = vmul.f32 %v471_v29, %v453_v35 }
  0xaa   :  { %442 = vst.msk [vmem:[#allocation2 + $0x5] ss:$8 sm:$0xf] %vm2694_vm0, %v439_v37  ;;  %v488_v42 = vcombine.low %v480_v33, %v481_v39  ;;  %v489_v43 = vcombine.low %v482_v40, %v483_v38  ;;  %v519_v44 = vpop.permute.xlu1 %518  ;;  %v517_v45 = vpop.permute.xlu0 %516 }
  0xab   :  { %v527_v51 = vsel %vm524_vm7, %v517_v45, %v519_v44 }
  0xac   :  { %v496_v49 = vrot.slane %v488_v42, %v2766_v27  ;;  %v503_v50 = vrot.slane %v489_v43, %v2766_v27  ;;  %v552_v56 = vmul.f32 %v535_v46, %v527_v51 }
  0xae   :  { %v504_v53 = vcombine.low %v496_v49, %v503_v50  ;;  %v523_v54 = vpop.permute.xlu1 %522  ;;  %v521_v55 = vpop.permute.xlu0 %520 }
  0xaf   :  { %v528_v57 = vsel %vm524_vm7, %v523_v54, %v517_v45  ;;  %v525_v58 = vsel %vm524_vm7, %v521_v55, %v523_v54  ;;  %v526_v59 = vsel %vm524_vm7, %v519_v44, %v521_v55 }
  0xb0   :  { %v511_v60 = vrot.slane %v504_v53, %v2766_v27  ;;  %v555_v61 = vmul.f32 %v547_v47, %v528_v57  ;;  %v553_v62 = vmul.f32 %v539_v48, %v526_v59  ;;  %v554_v63 = vmul.f32 %v543_v52, %v525_v58 }
  0xb2   :  { %514 = vst.msk [vmem:[#allocation2 + $0x6] ss:$8 sm:$0xf] %vm2694_vm0, %v511_v60  ;;  %v560_v2 = vcombine.low %v552_v56, %v553_v62  ;;  %v561_v3 = vcombine.low %v554_v63, %v555_v61  ;;  %v591_v9 = vpop.permute.xlu1 %590  ;;  %v589_v10 = vpop.permute.xlu0 %588 }
  0xb3   :  { %v599_v16 = vsel %vm596_vm8, %v589_v10, %v591_v9 }
  0xb4   :  { %v568_v14 = vrot.slane %v560_v2, %v2766_v27  ;;  %v575_v15 = vrot.slane %v561_v3, %v2766_v27  ;;  %v624_v22 = vmul.f32 %v607_v11, %v599_v16 }
  0xb6   :  { %v576_v19 = vcombine.low %v568_v14, %v575_v15  ;;  %v595_v20 = vpop.permute.xlu1 %594  ;;  %v593_v21 = vpop.permute.xlu0 %592 }
  0xb7   :  { %v600_v23 = vsel %vm596_vm8, %v595_v20, %v589_v10  ;;  %v597_v24 = vsel %vm596_vm8, %v593_v21, %v595_v20  ;;  %v598_v25 = vsel %vm596_vm8, %v591_v9, %v593_v21 }
  0xb8   :  { %v583_v26 = vrot.slane %v576_v19, %v2766_v27  ;;  %v627_v28 = vmul.f32 %v619_v12, %v600_v23  ;;  %v625_v29 = vmul.f32 %v611_v13, %v598_v25  ;;  %v626_v30 = vmul.f32 %v615_v17, %v597_v24  ;;  %v1356_v23 = vld [vmem:[%s3729_s4 + $0x8] sm:$0xff] }
  0xba   :  { %586 = vst.msk [vmem:[#allocation2 + $0x7] ss:$8 sm:$0xf] %vm2694_vm0, %v583_v26  ;;  %v632_v31 = vcombine.low %v624_v22, %v625_v29  ;;  %v633_v32 = vcombine.low %v626_v30, %v627_v28  ;;  %v1435_v26 = vld [vmem:[%s3730_s5] sm:$0xff]  ;;  %v1436_v30 = vld [vmem:[%s3730_s5 + $0x8] sm:$0xff] }
  0xbc   :  { %v640_v33 = vrot.slane %v632_v31, %v2766_v27  ;;  %v647_v34 = vrot.slane %v633_v32, %v2766_v27  ;;  %v1437_v31 = vld [vmem:[%s3730_s5 + $0x10] sm:$0xff] }
  0xbe   :  { %v648_v35 = vcombine.low %v640_v33, %v647_v34  ;;  %v1438_v34 = vld [vmem:[%s3730_s5 + $0x18] sm:$0xff] }
  0xc0   :  { %v655_v36 = vrot.slane %v648_v35, %v2766_v27  ;;  %v661_v27 = vld [vmem:[%s3728_s2 + $0x8] sm:$0xff] }
  0xc1   :  { %v663_v37 = vld [vmem:[#allocation2 + $0x8] sm:$0xff]  ;;  %v665_v38 = vld [vmem:[#allocation2 + $0x18] sm:$0xff]  ;;  %v662_v39 = vld [vmem:[#allocation2] sm:$0xff] }
  0xc2   :  { %658 = vst.msk [vmem:[#allocation2 + $0x20] ss:$8 sm:$0xf] %vm2694_vm0, %v655_v36  ;;  %v664_v46 = vld [vmem:[#allocation2 + $0x10] sm:$0xff] }
  0xc7   :  { %v675_v49 = vpop.permute.xlu0 %674  ;;  %v680_v56 = vpop.permute.xlu1 %679 }
  0xc9   :  { %v667_v40 = vld [vmem:[#allocation2 + $0x28] sm:$0xff]  ;;  %v669_v41 = vld [vmem:[#allocation2 + $0x38] sm:$0xff]  ;;  %v666_v42 = vld [vmem:[#allocation2 + $0x20] sm:$0xff] }
  0xca   :  { %v2396_v43 = vpack.c.bf16 %v667_v40, %v663_v37  ;;  %v2400_v44 = vpack.c.bf16 %v669_v41, %v665_v38  ;;  %v2398_v45 = vpack.c.bf16 %v666_v42, %v662_v39  ;;  %v668_v47 = vld [vmem:[#allocation2 + $0x30] sm:$0xff] }
  0xcb   :  { %v2402_v48 = vpack.c.bf16 %v668_v47, %v664_v46 }
  0xcc   :  { %2397 = vmatprep.subr.bf16.mxu0 %v2396_v43  ;;  %2401 = vmatprep.subr.bf16.mxu1 %v2400_v44 }
  0xcd   :  { %2399 = vmatpush1.bf16.msra.mxu0 %v2398_v45  ;;  %2403 = vmatpush1.bf16.msra.mxu1 %v2402_v48 }
  0xd0   :  { %2235 = vmatmul.mubr.msk.f32.vlgmr.msra.gmra.mrb[0].mxu0 %vm682_vm9, %v660_v4  ;;  %2237 = vmatmul.mubr.msk.f32.vlgmr.msra.gmra.mrb[0].mxu1 %vm682_vm9, %v660_v4 }
  0xd1   :  { %759 = vmatprep.mubr.f32.mxu0 %v3740_v1  ;;  %836 = vmatprep.mubr.f32.mxu1 %v3740_v1 }
  0xd4   :  { %2236 = vmatmul.mubr.msk.f32.gmra.mrb[2].mxu0 %vm682_vm9, %v661_v27  ;;  %2238 = vmatmul.mubr.msk.f32.gmra.mrb[2].mxu1 %vm682_vm9, %v661_v27 }
  0xd5   :  { %2246 = vmatprep.mubr.msk.f32.mxu0 %vm682_vm9, %v1356_v23  ;;  %2250 = vmatprep.mubr.msk.f32.mxu1 %vm682_vm9, %v1356_v23 }
 0x1a3   :  { %v755_v50 = vpop.f32.mrb[0].mxu0  ;;  %v832_v51 = vpop.f32.mrb[0].mxu1 }
 0x1a4   :  { %v756_v52 = vadd.f32 %v755_v50, %v675_v49  ;;  %v757_v53 = vpop.f32.mrb[1].mxu0  ;;  %v833_v54 = vadd.f32 %v832_v51, %v675_v49  ;;  %v834_v55 = vpop.f32.mrb[1].mxu1 }
 0x1a5   :  { %v758_v11 = vadd.f32 %v757_v53, %v675_v49  ;;  %v835_v13 = vadd.f32 %v834_v55, %v675_v49  ;;  %v875_v55 = vld [vmem:[%s3727_s1] ss:$8 sm:$0xf] }
 0x1a6   :  { %v2940_v57 = vmax.f32 %v756_v52, 0.0  ;;  %v2942_v60 = vmax.f32 %v833_v54, 0.0 }
 0x1a7   :  { %v761_v58 = vpop.f32.mrb[2].mxu0  ;;  %v838_v59 = vpop.f32.mrb[2].mxu1  ;;  %v3014_v12 = vmax.f32 %v758_v11, 0.0  ;;  %v3020_v15 = vmax.f32 %v835_v13, 0.0  ;;  %v880_v13 = vrot.slane %v875_v55, %v2704_v6 }
 0x1a8   :  { %v762_v61 = vadd.f32 %v761_v58, %v680_v56  ;;  %v839_v62 = vadd.f32 %v838_v59, %v680_v56  ;;  %v763_v63 = vpop.f32.mrb[3].mxu0  ;;  %v840_v0 = vpop.f32.mrb[3].mxu1  ;;  %851 = vrot.lane.b32.xlu1 %v2940_v57, %s2586_s0  ;;  %v884_v59 = vrot.slane %v875_v55, %v2710_v8 }
 0x1a9   :  { %v764_v14 = vadd.f32 %v763_v63, %v680_v56  ;;  %v841_v17 = vadd.f32 %v840_v0, %v680_v56 }
 0x1aa   :  { %v2946_v2 = vmax.f32 %v762_v61, 0.0  ;;  %v2948_v3 = vmax.f32 %v839_v62, 0.0  ;;  %v888_v61 = vrot.slane %v875_v55, %v2701_v5 }
 0x1ab   :  { %v3022_v16 = vmax.f32 %v764_v14, 0.0  ;;  %v3028_v19 = vmax.f32 %v841_v17, 0.0  ;;  %v892_v14 = vrot.slane %v875_v55, %v2707_v7 }
 0x1ac   :  { %853 = vrot.lane.b32.xlu0 %v2946_v2, %s2586_s0  ;;  %859 = vrot.lane.b32.xlu1 %v2942_v60, %s2586_s0 }
 0x1b0   :  { %861 = vrot.lane.b32.xlu0 %v2948_v3, %s2586_s0  ;;  %913 = vrot.lane.b32.xlu1 %v2940_v57, %s2587_s15 }
 0x1b4   :  { %915 = vrot.lane.b32.xlu0 %v2946_v2, %s2587_s15  ;;  %921 = vrot.lane.b32.xlu1 %v2942_v60, %s2587_s15 }
 0x1b8   :  { %923 = vrot.lane.b32.xlu0 %v2948_v3, %s2587_s15  ;;  %975 = vrot.lane.b32.xlu1 %v2940_v57, %s2588_s16 }
 0x1bc   :  { %977 = vrot.lane.b32.xlu0 %v2946_v2, %s2588_s16  ;;  %983 = vrot.lane.b32.xlu1 %v2942_v60, %s2588_s16 }
 0x1c0   :  { %985 = vrot.lane.b32.xlu0 %v2948_v3, %s2588_s16  ;;  %1037 = vrot.lane.b32.xlu1 %v2940_v57, %s2589_s17 }
 0x1c4   :  { %1039 = vrot.lane.b32.xlu0 %v2946_v2, %s2589_s17  ;;  %1045 = vrot.lane.b32.xlu1 %v2942_v60, %s2589_s17 }
 0x1c8   :  { %1047 = vrot.lane.b32.xlu0 %v2948_v3, %s2589_s17  ;;  %1107 = vrot.lane.b32.xlu1 %v2940_v57, %s2590_s18 }
 0x1cc   :  { %1109 = vrot.lane.b32.xlu0 %v2946_v2, %s2590_s18  ;;  %1115 = vrot.lane.b32.xlu1 %v2942_v60, %s2590_s18 }
 0x1d0   :  { %1117 = vrot.lane.b32.xlu0 %v2948_v3, %s2590_s18  ;;  %1169 = vrot.lane.b32.xlu1 %v2940_v57, %s2591_s19 }
 0x1d4   :  { %1171 = vrot.lane.b32.xlu0 %v2946_v2, %s2591_s19  ;;  %1177 = vrot.lane.b32.xlu1 %v2942_v60, %s2591_s19 }
 0x1d8   :  { %1179 = vrot.lane.b32.xlu0 %v2948_v3, %s2591_s19  ;;  %1231 = vrot.lane.b32.xlu1 %v2940_v57, %s2592_s20 }
 0x1dc   :  { %1233 = vrot.lane.b32.xlu0 %v2946_v2, %s2592_s20  ;;  %1239 = vrot.lane.b32.xlu1 %v2942_v60, %s2592_s20 }
 0x1e0   :  { %1241 = vrot.lane.b32.xlu0 %v2948_v3, %s2592_s20  ;;  %1293 = vrot.lane.b32.xlu1 %v2940_v57, %s2593_s21 }
 0x1e4   :  { %1295 = vrot.lane.b32.xlu0 %v2946_v2, %s2593_s21  ;;  %1301 = vrot.lane.b32.xlu1 %v2942_v60, %s2593_s21 }
 0x1e8   :  { %1303 = vrot.lane.b32.xlu0 %v2948_v3, %s2593_s21  ;;  %855 = vrot.lane.b32.xlu1 %v3014_v12, %s2586_s0 }
 0x1ec   :  { %857 = vrot.lane.b32.xlu0 %v3022_v16, %s2586_s0  ;;  %863 = vrot.lane.b32.xlu1 %v3020_v15, %s2586_s0 }
 0x1f0   :  { %865 = vrot.lane.b32.xlu0 %v3028_v19, %s2586_s0  ;;  %917 = vrot.lane.b32.xlu1 %v3014_v12, %s2587_s15 }
 0x1f4   :  { %919 = vrot.lane.b32.xlu0 %v3022_v16, %s2587_s15  ;;  %925 = vrot.lane.b32.xlu1 %v3020_v15, %s2587_s15 }
 0x1f8   :  { %927 = vrot.lane.b32.xlu0 %v3028_v19, %s2587_s15  ;;  %979 = vrot.lane.b32.xlu1 %v3014_v12, %s2588_s16 }
 0x1fc   :  { %981 = vrot.lane.b32.xlu0 %v3022_v16, %s2588_s16  ;;  %987 = vrot.lane.b32.xlu1 %v3020_v15, %s2588_s16 }
 0x200   :  { %989 = vrot.lane.b32.xlu0 %v3028_v19, %s2588_s16  ;;  %1041 = vrot.lane.b32.xlu1 %v3014_v12, %s2589_s17  ;;  %s2600_s16 = smov 36  }
 0x204   :  { %1043 = vrot.lane.b32.xlu0 %v3022_v16, %s2589_s17  ;;  %1049 = vrot.lane.b32.xlu1 %v3020_v15, %s2589_s17 }
 0x208   :  { %1051 = vrot.lane.b32.xlu0 %v3028_v19, %s2589_s17  ;;  %1111 = vrot.lane.b32.xlu1 %v3014_v12, %s2590_s18  ;;  %s2601_s17 = smov 4  }
 0x20c   :  { %1113 = vrot.lane.b32.xlu0 %v3022_v16, %s2590_s18  ;;  %1119 = vrot.lane.b32.xlu1 %v3020_v15, %s2590_s18 }
 0x210   :  { %1121 = vrot.lane.b32.xlu0 %v3028_v19, %s2590_s18  ;;  %1173 = vrot.lane.b32.xlu1 %v3014_v12, %s2591_s19 }
 0x214   :  { %1175 = vrot.lane.b32.xlu0 %v3022_v16, %s2591_s19  ;;  %1181 = vrot.lane.b32.xlu1 %v3020_v15, %s2591_s19 }
 0x218   :  { %1183 = vrot.lane.b32.xlu0 %v3028_v19, %s2591_s19  ;;  %1235 = vrot.lane.b32.xlu1 %v3014_v12, %s2592_s20 }
 0x21a   :  { %v3074_v20 = vpop.permute.xlu1 %851 }
 0x21c   :  { %1237 = vrot.lane.b32.xlu0 %v3022_v16, %s2592_s20  ;;  %1243 = vrot.lane.b32.xlu1 %v3020_v15, %s2592_s20 }
 0x21e   :  { %v3080_v21 = vpop.permute.xlu1 %859  ;;  %v3082_v22 = vpop.permute.xlu0 %853 }
 0x220   :  { %1245 = vrot.lane.b32.xlu0 %v3028_v19, %s2592_s20  ;;  %1297 = vrot.lane.b32.xlu1 %v3014_v12, %s2593_s21 }
 0x222   :  { %v3093_v24 = vpop.permute.xlu1 %913  ;;  %v3095_v25 = vpop.permute.xlu0 %861 }
 0x224   :  { %1299 = vrot.lane.b32.xlu0 %v3022_v16, %s2593_s21  ;;  %1305 = vrot.lane.b32.xlu1 %v3020_v15, %s2593_s21 }
 0x226   :  { %v3104_v28 = vpop.permute.xlu1 %921  ;;  %v3106_v29 = vpop.permute.xlu0 %915 }
 0x228   :  { %1307 = vrot.lane.b32.xlu0 %v3028_v19, %s2593_s21  ;;  %1441 = vperm.xlu1 %2576, %v1435_v26  }
 0x22a   :  { %v3116_v32 = vpop.permute.xlu1 %975  ;;  %v3118_v33 = vpop.permute.xlu0 %923 }
 0x22c   :  { %1446 = vperm.xlu0 %2575, %v1436_v30   ;;  %1451 = vperm.xlu1 %2576, %v1437_v31  }
 0x22e   :  { %v3123_v35 = vpop.permute.xlu1 %983  ;;  %v3125_v36 = vpop.permute.xlu0 %977 }
 0x230   :  { %1456 = vperm.xlu0 %2575, %v1438_v34  }
 0x232   :  { %v3127_v37 = vpop.permute.xlu1 %1037  ;;  %v3129_v38 = vpop.permute.xlu0 %985 }
 0x236   :  { %v3131_v39 = vpop.permute.xlu1 %1045  ;;  %v3133_v40 = vpop.permute.xlu0 %1039 }
 0x23a   :  { %v3135_v41 = vpop.permute.xlu1 %1107  ;;  %v3137_v42 = vpop.permute.xlu0 %1047 }
 0x23e   :  { %v3139_v43 = vpop.permute.xlu1 %1115  ;;  %v3141_v44 = vpop.permute.xlu0 %1109 }
 0x242   :  { %v3143_v45 = vpop.permute.xlu1 %1169  ;;  %v3145_v46 = vpop.permute.xlu0 %1117 }
 0x246   :  { %v3147_v47 = vpop.permute.xlu1 %1177  ;;  %v3149_v48 = vpop.permute.xlu0 %1171 }
 0x24a   :  { %v3151_v4 = vpop.permute.xlu1 %1231  ;;  %v3153_v27 = vpop.permute.xlu0 %1179 }
 0x24e   :  { %v3155_v49 = vpop.permute.xlu1 %1239  ;;  %v3157_v50 = vpop.permute.xlu0 %1233 }
 0x252   :  { %v3159_v51 = vpop.permute.xlu1 %1293  ;;  %v3161_v52 = vpop.permute.xlu0 %1241 }
 0x256   :  { %v3163_v53 = vpop.permute.xlu1 %1301  ;;  %v3165_v54 = vpop.permute.xlu0 %1295 }
 0x257   :  { %3746 = vst [vmem:[#allocation4_spill] sm:$0xff] %v3165_v54 }
 0x25a   :  { %v856_v56 = vpop.permute.xlu1 %855  ;;  %v3170_v58 = vpop.permute.xlu0 %1303 }
 0x25b   :  { %3747 = vst [vmem:[#allocation5_spill] sm:$0xff] %v3170_v58  ;;  %v869_v62 = vsel %vm87_vm1, %v856_v56, %v3080_v21  ;;  %v871_v63 = vsel %vm87_vm1, %v3074_v20, %v856_v56  ;;  %v2239_v56 = vld [vmem:[%s3727_s1 + $0x1] ss:$8 sm:$0xf] }
 0x25c   :  { %v898_v26 = vmul.f32 %v884_v59, %v871_v63  ;;  %v899_v30 = vmul.f32 %v888_v61, %v869_v62  ;;  %v946_v62 = vrot.slane %v2239_v56, %v2710_v8  ;;  %v942_v58 = vrot.slane %v2239_v56, %v2704_v6 }
 0x25e   :  { %v864_v0 = vpop.permute.xlu1 %863  ;;  %v858_v11 = vpop.permute.xlu0 %857 }
 0x25f   :  { %v870_v17 = vsel %vm87_vm1, %v858_v11, %v3095_v25  ;;  %v872_v23 = vsel %vm87_vm1, %v3082_v22, %v858_v11  ;;  %v867_v55 = vsel %vm87_vm1, %v3080_v21, %v864_v0  ;;  %v873_v1 = vsel %vm87_vm1, %v864_v0, %v3074_v20 }
 0x260   :  { %v902_v31 = vmul.f32 %v884_v59, %v872_v23  ;;  %v903_v34 = vmul.f32 %v888_v61, %v870_v17  ;;  %v950_v59 = vrot.slane %v2239_v56, %v2701_v5  ;;  %v897_v63 = vmul.f32 %v880_v13, %v873_v1 }
 0x261   :  { %v900_v17 = vmul.f32 %v892_v14, %v867_v55  ;;  %v954_v1 = vrot.slane %v2239_v56, %v2707_v7 }
 0x262   :  { %v2442_v10 = vpack.c.bf16 %v903_v34, %v899_v30  ;;  %v918_v9 = vpop.permute.xlu1 %917  ;;  %v866_v54 = vpop.permute.xlu0 %865  ;;  %v2404_v11 = vpack.c.bf16 %v902_v31, %v898_v26 }
 0x263   :  { %v868_v61 = vsel %vm87_vm1, %v3095_v25, %v866_v54  ;;  %v874_v21 = vsel %vm87_vm1, %v866_v54, %v3082_v22  ;;  %v931_v0 = vsel %vm161_vm2, %v918_v9, %v3104_v28  ;;  %v933_v26 = vsel %vm161_vm2, %v3093_v24, %v918_v9 }
 0x264   :  { %v901_v23 = vmul.f32 %v880_v13, %v874_v21  ;;  %v904_v20 = vmul.f32 %v892_v14, %v868_v61  ;;  %2405 = vmatprep.subr.bf16.mxu0 %v2404_v11  ;;  %v960_v13 = vmul.f32 %v946_v62, %v933_v26  ;;  %v961_v14 = vmul.f32 %v950_v59, %v931_v0  ;;  %v2240_v11 = vld [vmem:[%s3727_s1 + $0x2] ss:$8 sm:$0xf] }
 0x266   :  { %v2406_v30 = vpack.c.bf16 %v901_v23, %v897_v63  ;;  %v926_v31 = vpop.permute.xlu1 %925  ;;  %v920_v25 = vpop.permute.xlu0 %919  ;;  %v2440_v34 = vpack.c.bf16 %v904_v20, %v900_v17  ;;  %v1012_v23 = vrot.slane %v2240_v11, %v2701_v5 }
 0x267   :  { %v932_v22 = vsel %vm161_vm2, %v920_v25, %v3118_v33  ;;  %v934_v54 = vsel %vm161_vm2, %v3106_v29, %v920_v25  ;;  %v929_v56 = vsel %vm161_vm2, %v3104_v28, %v926_v31  ;;  %v935_v61 = vsel %vm161_vm2, %v926_v31, %v3093_v24 }
 0x268   :  { %v964_v55 = vmul.f32 %v946_v62, %v934_v54  ;;  %v965_v9 = vmul.f32 %v950_v59, %v932_v22  ;;  %2407 = vmatpush1.bf16.msra.mxu0 %v2406_v30  ;;  %2441 = vmatprep.subr.bf16.mxu1 %v2440_v34  ;;  %v1008_v59 = vrot.slane %v2240_v11, %v2710_v8 }
 0x269   :  { %2443 = vmatpush1.bf16.msra.mxu1 %v2442_v10  ;;  %v959_v0 = vmul.f32 %v942_v58, %v935_v61  ;;  %v962_v24 = vmul.f32 %v954_v1, %v929_v56  ;;  %v1004_v54 = vrot.slane %v2240_v11, %v2704_v6  ;;  %v2241_v56 = vld [vmem:[%s3727_s1 + $0x3] ss:$8 sm:$0xf] }
 0x26a   :  { %v2446_v21 = vpack.c.bf16 %v965_v9, %v961_v14  ;;  %v980_v63 = vpop.permute.xlu1 %979  ;;  %v928_v17 = vpop.permute.xlu0 %927  ;;  %v2408_v62 = vpack.c.bf16 %v964_v55, %v960_v13 }
 0x26b   :  { %v930_v20 = vsel %vm161_vm2, %v3118_v33, %v928_v17  ;;  %v936_v28 = vsel %vm161_vm2, %v928_v17, %v3106_v29  ;;  %v993_v10 = vsel %vm233_vm3, %v980_v63, %v3123_v35  ;;  %v995_v31 = vsel %vm233_vm3, %v3116_v32, %v980_v63 }
 0x26c   :  { %v963_v26 = vmul.f32 %v942_v58, %v936_v28  ;;  %v966_v30 = vmul.f32 %v954_v1, %v930_v20  ;;  %2409 = vmatprep.subr.bf16.mxu0 %v2408_v62  ;;  %v1016_v29 = vrot.slane %v2240_v11, %v2707_v7  ;;  %v1022_v13 = vmul.f32 %v1008_v59, %v995_v31 }
 0x26d   :  { %v1023_v14 = vmul.f32 %v1012_v23, %v993_v10  ;;  %v1074_v20 = vrot.slane %v2241_v56, %v2701_v5 }
 0x26e   :  { %v2410_v25 = vpack.c.bf16 %v963_v26, %v959_v0  ;;  %v988_v34 = vpop.permute.xlu1 %987  ;;  %v982_v33 = vpop.permute.xlu0 %981  ;;  %v2444_v22 = vpack.c.bf16 %v966_v30, %v962_v24 }
 0x26f   :  { %v994_v58 = vsel %vm233_vm3, %v982_v33, %v3129_v38  ;;  %v996_v1 = vsel %vm233_vm3, %v3125_v36, %v982_v33  ;;  %v991_v11 = vsel %vm233_vm3, %v3123_v35, %v988_v34  ;;  %v997_v61 = vsel %vm233_vm3, %v988_v34, %v3116_v32 }
 0x270   :  { %v1026_v55 = vmul.f32 %v1008_v59, %v996_v1  ;;  %v1027_v9 = vmul.f32 %v1012_v23, %v994_v58  ;;  %2411 = vmatpush1.bf16.msra.mxu0 %v2410_v25  ;;  %2445 = vmatprep.subr.bf16.mxu1 %v2444_v22  ;;  %v1070_v23 = vrot.slane %v2241_v56, %v2710_v8 }
 0x271   :  { %2447 = vmatpush1.bf16.msra.mxu1 %v2446_v21  ;;  %v1021_v0 = vmul.f32 %v1004_v54, %v997_v61  ;;  %v1024_v32 = vmul.f32 %v1016_v29, %v991_v11  ;;  %v1066_v34 = vrot.slane %v2241_v56, %v2704_v6 }
 0x272   :  { %v2450_v63 = vpack.c.bf16 %v1027_v9, %v1023_v14  ;;  %v1042_v17 = vpop.permute.xlu1 %1041  ;;  %v990_v62 = vpop.permute.xlu0 %989  ;;  %v2412_v59 = vpack.c.bf16 %v1026_v55, %v1022_v13  ;;  %v2242_v13 = vld [vmem:[%s3727_s1 + $0x5] ss:$8 sm:$0xf] }
 0x273   :  { %v992_v28 = vsel %vm233_vm3, %v3129_v38, %v990_v62  ;;  %v998_v35 = vsel %vm233_vm3, %v990_v62, %v3125_v36  ;;  %v1055_v21 = vsel %vm305_vm4, %v1042_v17, %v3131_v39  ;;  %v1057_v30 = vsel %vm305_vm4, %v3127_v37, %v1042_v17 }
 0x274   :  { %v1025_v24 = vmul.f32 %v1004_v54, %v998_v35  ;;  %v1028_v26 = vmul.f32 %v1016_v29, %v992_v28  ;;  %2413 = vmatprep.subr.bf16.mxu0 %v2412_v59  ;;  %v1078_v36 = vrot.slane %v2241_v56, %v2707_v7  ;;  %v1084_v54 = vmul.f32 %v1070_v23, %v1057_v30  ;;  %v2243_v30 = vld [vmem:[%s3727_s1 + $0x6] ss:$8 sm:$0xf] }
 0x275   :  { %v1085_v29 = vmul.f32 %v1074_v20, %v1055_v21  ;;  %v1140_v17 = vrot.slane %v2242_v13, %v2710_v8 }
 0x276   :  { %v2414_v10 = vpack.c.bf16 %v1025_v24, %v1021_v0  ;;  %v1050_v31 = vpop.permute.xlu1 %1049  ;;  %v1044_v38 = vpop.permute.xlu0 %1043  ;;  %v2448_v25 = vpack.c.bf16 %v1028_v26, %v1024_v32  ;;  %v1136_v24 = vrot.slane %v2242_v13, %v2704_v6 }
 0x277   :  { %v1056_v33 = vsel %vm305_vm4, %v1044_v38, %v3137_v42  ;;  %v1058_v22 = vsel %vm305_vm4, %v3133_v40, %v1044_v38  ;;  %v1053_v14 = vsel %vm305_vm4, %v3131_v39, %v1050_v31  ;;  %v1059_v55 = vsel %vm305_vm4, %v1050_v31, %v3127_v37 }
 0x278   :  { %v1088_v58 = vmul.f32 %v1070_v23, %v1058_v22  ;;  %v1089_v1 = vmul.f32 %v1074_v20, %v1056_v33  ;;  %2415 = vmatpush1.bf16.msra.mxu0 %v2414_v10  ;;  %2449 = vmatprep.subr.bf16.mxu1 %v2448_v25  ;;  %v1083_v59 = vmul.f32 %v1066_v34, %v1059_v55 }
 0x279   :  { %2451 = vmatpush1.bf16.msra.mxu1 %v2450_v63  ;;  %v1086_v23 = vmul.f32 %v1078_v36, %v1053_v14  ;;  %v1148_v10 = vrot.slane %v2242_v13, %v2707_v7  ;;  %v1198_v33 = vrot.slane %v2243_v30, %v2704_v6  ;;  %v3748_v55 = vpack.c.bf16 %v2946_v2, %v2940_v57 }
 0x27a   :  { %v2454_v9 = vpack.c.bf16 %v1089_v1, %v1085_v29  ;;  %v1112_v56 = vpop.permute.xlu1 %1111  ;;  %v1052_v11 = vpop.permute.xlu0 %1051  ;;  %v2416_v61 = vpack.c.bf16 %v1088_v58, %v1084_v54  ;;  %v1202_v1 = vrot.slane %v2243_v30, %v2710_v8  ;;  %v1206_v57 = vrot.slane %v2243_v30, %v2701_v5 }
 0x27b   :  { %v1054_v62 = vsel %vm305_vm4, %v3137_v42, %v1052_v11  ;;  %v1060_v39 = vsel %vm305_vm4, %v1052_v11, %v3133_v40  ;;  %v1125_v63 = vsel %vm380_vm5, %v1112_v56, %v3139_v43  ;;  %v2420_v42 = vpack.c.bf16 %v3022_v16, %v3014_v12 }
 0x27c   :  { %v1087_v20 = vmul.f32 %v1066_v34, %v1060_v39  ;;  %v1090_v37 = vmul.f32 %v1078_v36, %v1054_v62  ;;  %2417 = vmatprep.subr.bf16.mxu0 %v2416_v61  ;;  %v1144_v40 = vrot.slane %v2242_v13, %v2701_v5  ;;  %v1127_v12 = vsel %vm380_vm5, %v3135_v41, %v1112_v56 }
 0x27d   :  { %v1154_v16 = vmul.f32 %v1140_v17, %v1125_v63  ;;  %v2456_v34 = vpack.c.bf16 %v3028_v19, %v3020_v15  ;;  %v1153_v58 = vmul.f32 %v1136_v24, %v1127_v12  ;;  %v1210_v2 = vrot.slane %v2243_v30, %v2707_v7 }
 0x27e   :  { %v2418_v28 = vpack.c.bf16 %v1087_v20, %v1083_v59  ;;  %v1120_v35 = vpop.permute.xlu1 %1119  ;;  %v1114_v0 = vpop.permute.xlu0 %1113  ;;  %v2452_v32 = vpack.c.bf16 %v1090_v37, %v1086_v23 }
 0x27f   :  { %v1126_v26 = vsel %vm380_vm5, %v1114_v0, %v3145_v46  ;;  %v1128_v21 = vsel %vm380_vm5, %v3141_v44, %v1114_v0  ;;  %v1123_v38 = vsel %vm380_vm5, %v3139_v43, %v1120_v35  ;;  %v1129_v25 = vsel %vm380_vm5, %v1120_v35, %v3135_v41 }
 0x280   :  { %v1158_v31 = vmul.f32 %v1140_v17, %v1126_v26  ;;  %2419 = vmatpush1.bf16.msra.mxu0 %v2418_v28  ;;  %2453 = vmatprep.subr.bf16.mxu1 %v2452_v32  ;;  %v1157_v36 = vmul.f32 %v1136_v24, %v1128_v21  ;;  %v1155_v15 = vmul.f32 %v1144_v40, %v1123_v38 }
 0x281   :  { %2421 = vmatprep.subr.bf16.mxu0 %v2420_v42  ;;  %2455 = vmatpush1.bf16.msra.mxu1 %v2454_v9  ;;  %v1156_v19 = vmul.f32 %v1148_v10, %v1129_v25 }
 0x282   :  { %v1174_v22 = vpop.permute.xlu1 %1173  ;;  %v1122_v54 = vpop.permute.xlu0 %1121  ;;  %v2424_v29 = vpack.c.bf16 %v1158_v31, %v1154_v16  ;;  %2457 = vmatprep.subr.bf16.mxu1 %v2456_v34  ;;  %v2426_v56 = vpack.c.bf16 %v1157_v36, %v1153_v58 }
 0x283   :  { %v1124_v41 = vsel %vm380_vm5, %v3145_v46, %v1122_v54  ;;  %v1130_v43 = vsel %vm380_vm5, %v1122_v54, %v3141_v44  ;;  %v1187_v9 = vsel %vm452_vm6, %v1174_v22, %v3147_v47  ;;  %v1189_v46 = vsel %vm452_vm6, %v3143_v45, %v1174_v22 }
 0x284   :  { %v1159_v13 = vmul.f32 %v1144_v40, %v1124_v41  ;;  %v1160_v14 = vmul.f32 %v1148_v10, %v1130_v43  ;;  %2423 = vmatpush1.bf16.msra.mxu0 %v3748_v55  ;;  %v3749_v44 = vpack.c.bf16 %v2948_v3, %v2942_v60  ;;  %v1215_v23 = vmul.f32 %v1198_v33, %v1189_v46  ;;  %v2244_v3 = vld [vmem:[%s3727_s1 + $0x7] ss:$8 sm:$0xf] }
 0x285   :  { %2425 = vmatprep.subr.bf16.mxu0 %v2424_v29  ;;  %v1216_v20 = vmul.f32 %v1202_v1, %v1187_v9  ;;  %v1260_v24 = vrot.slane %v2244_v3, %v2704_v6  ;;  %v1264_v40 = vrot.slane %v2244_v3, %v2710_v8  ;;  %v1272_v34 = vrot.slane %v2244_v3, %v2707_v7 }
 0x286   :  { %v2462_v11 = vpack.c.bf16 %v1159_v13, %v1155_v15  ;;  %2459 = vmatpush1.bf16.msra.mxu1 %v3749_v44  ;;  %v1182_v61 = vpop.permute.xlu1 %1181  ;;  %v1176_v17 = vpop.permute.xlu0 %1175  ;;  %v2460_v62 = vpack.c.bf16 %v1160_v14, %v1156_v19 }
 0x287   :  { %v1188_v39 = vsel %vm452_vm6, %v1176_v17, %v3153_v27  ;;  %v1190_v59 = vsel %vm452_vm6, %v3149_v48, %v1176_v17  ;;  %v1185_v63 = vsel %vm452_vm6, %v3147_v47, %v1182_v61  ;;  %v1191_v28 = vsel %vm452_vm6, %v1182_v61, %v3143_v45 }
 0x288   :  { %v1219_v37 = vmul.f32 %v1198_v33, %v1190_v59  ;;  %v1220_v60 = vmul.f32 %v1202_v1, %v1188_v39  ;;  %2427 = vmatpush1.bf16.msra.mxu0 %v2426_v56  ;;  %2461 = vmatprep.subr.bf16.mxu1 %v2460_v62  ;;  %v1217_v21 = vmul.f32 %v1206_v57, %v1185_v63  ;;  %v2245_v1 = vld [vmem:[%s3727_s1 + $0x20] ss:$8 sm:$0xf] }
 0x289   :  { %v1218_v45 = vmul.f32 %v1210_v2, %v1191_v28  ;;  %v1322_v55 = vrot.slane %v2245_v1, %v2704_v6  ;;  %v1326_v9 = vrot.slane %v2245_v1, %v2710_v8  ;;  %v3751_v59 = vld [vmem:[#allocation4_spill] sm:$0xff] }
 0x28a   :  { %v2430_v35 = vpack.c.bf16 %v1219_v37, %v1215_v23  ;;  %2463 = vmatpush1.bf16.msra.mxu1 %v2462_v11  ;;  %v1236_v0 = vpop.permute.xlu1 %1235  ;;  %v1184_v32 = vpop.permute.xlu0 %1183  ;;  %v2428_v42 = vpack.c.bf16 %v1220_v60, %v1216_v20  ;;  %v1681_v20 = vld [vmem:[%s3731_s6 + $0x80] sm:$0xff]  ;;  %v1682_v37 = vld [vmem:[%s3731_s6 + $0x88] sm:$0xff] }
 0x28b   :  { %v1186_v26 = vsel %vm452_vm6, %v3153_v27, %v1184_v32  ;;  %v1192_v47 = vsel %vm452_vm6, %v1184_v32, %v3149_v48  ;;  %v1249_v16 = vsel %vm524_vm7, %v1236_v0, %v3155_v49  ;;  %v1251_v10 = vsel %vm524_vm7, %v3151_v4, %v1236_v0 }
 0x28c   :  { %v1221_v30 = vmul.f32 %v1206_v57, %v1186_v26  ;;  %v1222_v12 = vmul.f32 %v1210_v2, %v1192_v47  ;;  %2429 = vmatprep.subr.bf16.mxu0 %v2428_v42  ;;  %v1268_v48 = vrot.slane %v2244_v3, %v2701_v5  ;;  %v1277_v22 = vmul.f32 %v1260_v24, %v1251_v10  ;;  %v3750_v2 = vld [vmem:[#allocation5_spill] sm:$0xff]  ;;  %v1713_v26 = vld [vmem:[%s3731_s6 + $0x180] sm:$0xff] }
 0x28d   :  { %2431 = vmatpush1.bf16.msra.mxu0 %v2430_v35  ;;  %v1278_v54 = vmul.f32 %v1264_v40, %v1249_v16  ;;  %v1334_v57 = vrot.slane %v2245_v1, %v2707_v7  ;;  %v2476_v42 = vpack.c.bf16 %v1682_v37, %v1681_v20  ;;  %v1714_v47 = vld [vmem:[%s3731_s6 + $0x188] sm:$0xff]  ;;  %v1684_v16 = vld [vmem:[%s3731_s6 + $0x98] sm:$0xff]  ;;  %v1355_v10 = vld [vmem:[%s3729_s4] sm:$0xff] }
 0x28e   :  { %v2466_v31 = vpack.c.bf16 %v1221_v30, %v1217_v21  ;;  %v1244_v27 = vpop.permute.xlu1 %1243  ;;  %v1238_v38 = vpop.permute.xlu0 %1237  ;;  %v2464_v25 = vpack.c.bf16 %v1222_v12, %v1218_v45  ;;  %v1690_v20 = vld [vmem:[%s3731_s6 + $0xc8] sm:$0xff]  ;;  %v1719_v37 = vld [vmem:[%s3731_s6 + $0x1b0] sm:$0xff] }
 0x28f   :  { %v1250_v36 = vsel %vm524_vm7, %v1238_v38, %v3161_v52  ;;  %v1252_v33 = vsel %vm524_vm7, %v3157_v50, %v1238_v38  ;;  %v1247_v41 = vsel %vm524_vm7, %v3155_v49, %v1244_v27  ;;  %v1253_v43 = vsel %vm524_vm7, %v1244_v27, %v3151_v4  ;;  %v1358_v38 = vld [vmem:[%s3729_s4 + $0x18] sm:$0xff] }
 0x290   :  { %v1281_v29 = vmul.f32 %v1260_v24, %v1252_v33  ;;  %v1282_v58 = vmul.f32 %v1264_v40, %v1250_v36  ;;  %2465 = vmatprep.subr.bf16.mxu1 %v2464_v25  ;;  %v1279_v56 = vmul.f32 %v1268_v48, %v1247_v41  ;;  %v1280_v11 = vmul.f32 %v1272_v34, %v1253_v43  ;;  %v1665_v24 = vld [vmem:[%s3731_s6] sm:$0xff]  ;;  %v1668_v36 = vld [vmem:[%s3731_s6 + $0x18] sm:$0xff]  ;;  %v1357_v43 = vld [vmem:[%s3729_s4 + $0x10] sm:$0xff] }
 0x291   :  { %2467 = vmatpush1.bf16.msra.mxu1 %v2466_v31  ;;  %v2480_v33 = vpack.c.bf16 %v1684_v16, %v1683_v18  ;;  %v1716_v41 = vld [vmem:[%s3731_s6 + $0x198] sm:$0xff]  ;;  %v1705_v18 = vld [vmem:[%s3731_s6 + $0x140] sm:$0xff]  ;;  %v1706_v16 = vld [vmem:[%s3731_s6 + $0x148] sm:$0xff] }
 0x292   :  { %v2434_v15 = vpack.c.bf16 %v1281_v29, %v1277_v22  ;;  %v1298_v19 = vpop.permute.xlu1 %1297  ;;  %v1246_v13 = vpop.permute.xlu0 %1245  ;;  %v2432_v14 = vpack.c.bf16 %v1282_v58, %v1278_v54  ;;  %v1697_v22 = vld [vmem:[%s3731_s6 + $0x100] sm:$0xff]  ;;  %v1698_v54 = vld [vmem:[%s3731_s6 + $0x108] sm:$0xff] }
 0x293   :  { %v1248_v46 = vsel %vm524_vm7, %v3161_v52, %v1246_v13  ;;  %v1254_v49 = vsel %vm524_vm7, %v1246_v13, %v3157_v50  ;;  %v1311_v61 = vsel %vm596_vm8, %v1298_v19, %v3163_v53  ;;  %v1313_v6 = vsel %vm596_vm8, %v3159_v51, %v1298_v19  ;;  %v1685_v29 = vld [vmem:[%s3731_s6 + $0xa0] sm:$0xff]  ;;  %v1686_v58 = vld [vmem:[%s3731_s6 + $0xa8] sm:$0xff] }
 0x294   :  { %v1283_v4 = vmul.f32 %v1268_v48, %v1248_v46  ;;  %v1284_v44 = vmul.f32 %v1272_v34, %v1254_v49  ;;  %2433 = vmatprep.subr.bf16.mxu0 %v2432_v14  ;;  %v1330_v50 = vrot.slane %v2245_v1, %v2701_v5  ;;  %v1339_v60 = vmul.f32 %v1322_v55, %v1313_v6  ;;  %v1667_v34 = vld [vmem:[%s3731_s6 + $0x10] sm:$0xff]  ;;  %v1669_v14 = vld [vmem:[%s3731_s6 + $0x20] sm:$0xff] }
 0x295   :  { %2435 = vmatpush1.bf16.msra.mxu0 %v2434_v15  ;;  %v1340_v5 = vmul.f32 %v1326_v9, %v1311_v61  ;;  %v2508_v48 = vpack.c.bf16 %v1714_v47, %v1713_v26  ;;  %v1715_v1 = vld [vmem:[%s3731_s6 + $0x190] sm:$0xff]  ;;  %v1360_v15 = vld [vmem:[%s3729_s4 + $0x28] sm:$0xff]  ;;  %v2482_v19 = vpack.c.bf16 %v1668_v36, %v1667_v34  ;;  %v2510_v13 = vpack.c.bf16 %v1698_v54, %v1697_v22  ;;  %v1359_v6 = vld [vmem:[%s3729_s4 + $0x20] sm:$0xff] }
 0x296   :  { %v2470_v8 = vpack.c.bf16 %v1283_v4, %v1279_v56  ;;  %v1306_v52 = vpop.permute.xlu1 %1305  ;;  %v1300_v17 = vpop.permute.xlu0 %1299  ;;  %v2468_v62 = vpack.c.bf16 %v1284_v44, %v1280_v11  ;;  %v2512_v46 = vpack.c.bf16 %v1716_v41, %v1715_v1  ;;  %v1699_v49 = vld [vmem:[%s3731_s6 + $0x110] sm:$0xff]  ;;  %v1700_v56 = vld [vmem:[%s3731_s6 + $0x118] sm:$0xff]  ;;  %v1717_v44 = vld [vmem:[%s3731_s6 + $0x1a0] sm:$0xff] }
 0x297   :  { %v1312_v39 = vsel %vm596_vm8, %v1300_v17, %v3750_v2  ;;  %v1314_v23 = vsel %vm596_vm8, %v3751_v59, %v1300_v17  ;;  %v1309_v63 = vsel %vm596_vm8, %v3163_v53, %v1306_v52  ;;  %v1315_v28 = vsel %vm596_vm8, %v1306_v52, %v3159_v51  ;;  %v1666_v51 = vld [vmem:[%s3731_s6 + $0x8] sm:$0xff]  ;;  %v1687_v11 = vld [vmem:[%s3731_s6 + $0xb0] sm:$0xff]  ;;  %v1688_v4 = vld [vmem:[%s3731_s6 + $0xb8] sm:$0xff] }
 0x298   :  { %v1343_v3 = vmul.f32 %v1322_v55, %v1314_v23  ;;  %v1344_v7 = vmul.f32 %v1326_v9, %v1312_v39  ;;  %2469 = vmatprep.subr.bf16.mxu1 %v2468_v62  ;;  %v1341_v21 = vmul.f32 %v1330_v50, %v1309_v63  ;;  %v1342_v45 = vmul.f32 %v1334_v57, %v1315_v28  ;;  %v1670_v55 = vld [vmem:[%s3731_s6 + $0x28] sm:$0xff]  ;;  %v1671_v62 = vld [vmem:[%s3731_s6 + $0x30] sm:$0xff]  ;;  %v1701_v39 = vld [vmem:[%s3731_s6 + $0x120] sm:$0xff] }
 0x299   :  { %2471 = vmatpush1.bf16.msra.mxu1 %v2470_v8  ;;  %v2478_v25 = vpack.c.bf16 %v1666_v51, %v1665_v24  ;;  %v2484_v9 = vpack.c.bf16 %v1686_v58, %v1685_v29  ;;  %v1718_v61 = vld [vmem:[%s3731_s6 + $0x1a8] sm:$0xff]  ;;  %v1362_v8 = vld [vmem:[%s3729_s4 + $0x38] sm:$0xff]  ;;  %v2486_v52 = vpack.c.bf16 %v1670_v55, %v1669_v14  ;;  %v2514_v17 = vpack.c.bf16 %v1700_v56, %v1699_v49  ;;  %v1689_v23 = vld [vmem:[%s3731_s6 + $0xc0] sm:$0xff] }
 0x29a   :  { %v2438_v35 = vpack.c.bf16 %v1343_v3, %v1339_v60  ;;  %v1308_v0 = vpop.permute.xlu0 %1307  ;;  %v2436_v32 = vpack.c.bf16 %v1344_v7, %v1340_v5  ;;  %v1720_v60 = vld [vmem:[%s3731_s6 + $0x1b8] sm:$0xff]  ;;  %v1361_v5 = vld [vmem:[%s3729_s4 + $0x30] sm:$0xff]  ;;  %v1673_v63 = vld [vmem:[%s3731_s6 + $0x40] sm:$0xff] }
 0x29b   :  { %v1310_v40 = vsel %vm596_vm8, %v3750_v2, %v1308_v0  ;;  %v1316_v53 = vsel %vm596_vm8, %v1308_v0, %v3751_v59  ;;  %v2516_v2 = vpack.c.bf16 %v1718_v61, %v1717_v44  ;;  %v1702_v59 = vld [vmem:[%s3731_s6 + $0x128] sm:$0xff]  ;;  %v2520_v0 = vpack.c.bf16 %v1720_v60, %v1719_v37  ;;  %v1691_v24 = vld [vmem:[%s3731_s6 + $0xd0] sm:$0xff]  ;;  %v1708_v58 = vld [vmem:[%s3731_s6 + $0x158] sm:$0xff] }
 0x29c   :  { %v1345_v30 = vmul.f32 %v1330_v50, %v1310_v40  ;;  %v1346_v12 = vmul.f32 %v1334_v57, %v1316_v53  ;;  %2437 = vmatprep.subr.bf16.mxu0 %v2436_v32  ;;  %v1672_v50 = vld [vmem:[%s3731_s6 + $0x38] sm:$0xff]  ;;  %v2488_v57 = vpack.c.bf16 %v1688_v4, %v1687_v11  ;;  %v2518_v7 = vpack.c.bf16 %v1702_v59, %v1701_v39  ;;  %v1674_v28 = vld [vmem:[%s3731_s6 + $0x48] sm:$0xff]  ;;  %v1703_v32 = vld [vmem:[%s3731_s6 + $0x130] sm:$0xff] }
 0x29d   :  { %2439 = vmatpush1.bf16.msra.mxu0 %v2438_v35  ;;  %v2490_v3 = vpack.c.bf16 %v1672_v50, %v1671_v62  ;;  %v2492_v35 = vpack.c.bf16 %v1690_v20, %v1689_v23  ;;  %v1692_v40 = vld [vmem:[%s3731_s6 + $0xd8] sm:$0xff]  ;;  %v1721_v53 = vld [vmem:[%s3731_s6 + $0x1c0] sm:$0xff]  ;;  %v1722_v51 = vld [vmem:[%s3731_s6 + $0x1c8] sm:$0xff]  ;;  %v2494_v26 = vpack.c.bf16 %v1674_v28, %v1673_v63 }
 0x29e   :  { %v2474_v31 = vpack.c.bf16 %v1345_v30, %v1341_v21  ;;  %v2472_v27 = vpack.c.bf16 %v1346_v12, %v1342_v45  ;;  %2477 = vmatprep.subr.bf16.mxu0 %v2476_v42  ;;  %v1704_v42 = vld [vmem:[%s3731_s6 + $0x138] sm:$0xff]  ;;  %v1675_v21 = vld [vmem:[%s3731_s6 + $0x50] sm:$0xff]  ;;  %v2496_v30 = vpack.c.bf16 %v1692_v40, %v1691_v24  ;;  %v2524_v12 = vpack.c.bf16 %v1722_v51, %v1721_v53  ;;  %v1678_v22 = vld [vmem:[%s3731_s6 + $0x68] sm:$0xff] }
 0x29f   :  { %v2522_v47 = vpack.c.bf16 %v1704_v42, %v1703_v32  ;;  %v1676_v45 = vld [vmem:[%s3731_s6 + $0x58] sm:$0xff]  ;;  %v1707_v54 = vld [vmem:[%s3731_s6 + $0x150] sm:$0xff]  ;;  %v1709_v49 = vld [vmem:[%s3731_s6 + $0x160] sm:$0xff] }
 0x2a0   :  { %1536 = vmatmul.mubr.f32.vlgmr.msra.gmra.mrb[4].mxu0 %v1355_v10  ;;  %2473 = vmatprep.subr.bf16.mxu1 %v2472_v27  ;;  %v1723_v27 = vld [vmem:[%s3731_s6 + $0x1d0] sm:$0xff]  ;;  %v2530_v1 = vpack.c.bf16 %v1708_v58, %v1707_v54  ;;  %v1680_v55 = vld [vmem:[%s3731_s6 + $0x78] sm:$0xff]  ;;  %v1710_v56 = vld [vmem:[%s3731_s6 + $0x168] sm:$0xff] }
 0x2a1   :  { %2475 = vmatpush1.bf16.msra.mxu1 %v2474_v31  ;;  %2247 = vmatprep.mubr.msk.f32.mxu0 %vm682_vm9, %v1358_v38  ;;  %v1694_v31 = vld [vmem:[%s3731_s6 + $0xe8] sm:$0xff]  ;;  %v1695_v41 = vld [vmem:[%s3731_s6 + $0xf0] sm:$0xff]  ;;  %v2534_v11 = vpack.c.bf16 %v1710_v56, %v1709_v49  ;;  %v1728_v44 = vld [vmem:[%s3731_s6 + $0x1f8] sm:$0xff] }
 0x2a2   :  { %2479 = vmatpush3.bf16.msra.mxu0 %v2478_v25  ;;  %2509 = vmatprep.subr.bf16.mxu1 %v2508_v48  ;;  %v2498_v25 = vpack.c.bf16 %v1676_v45, %v1675_v21  ;;  %v2526_v48 = vpack.c.bf16 %v1706_v16, %v1705_v18  ;;  %v1679_v14 = vld [vmem:[%s3731_s6 + $0x70] sm:$0xff]  ;;  %v1931_v49 = vld [vmem:[%s3733_s9] sm:$0xff] }
 0x2a3   :  { %2481 = vmatprep.subr.bf16.mxu0 %v2480_v33  ;;  %v1677_v33 = vld [vmem:[%s3731_s6 + $0x60] sm:$0xff]  ;;  %v1727_v4 = vld [vmem:[%s3731_s6 + $0x1f0] sm:$0xff] }
 0x2a4   :  { %1542 = vmatmul.mubr.f32.gmra.mrb[6].mxu0 %v1357_v43  ;;  %1625 = vmatmul.mubr.f32.vlgmr.msra.gmra.mrb[4].mxu1 %v1355_v10  ;;  %v1693_v10 = vld [vmem:[%s3731_s6 + $0xe0] sm:$0xff]  ;;  %v2502_v29 = vpack.c.bf16 %v1678_v22, %v1677_v33  ;;  %v2536_v61 = vpack.c.bf16 %v1728_v44, %v1727_v4  ;;  %v1938_v4 = vld [vmem:[%s3732_s10 + $0x10] sm:$0xff]  ;;  %v1939_v44 = vld [vmem:[%s3732_s10 + $0x18] sm:$0xff] }
 0x2a5   :  { %2248 = vmatprep.mubr.msk.f32.mxu0 %vm682_vm9, %v1360_v15  ;;  %2251 = vmatprep.mubr.msk.f32.mxu1 %vm682_vm9, %v1358_v38  ;;  %v1724_v38 = vld [vmem:[%s3731_s6 + $0x1d8] sm:$0xff]  ;;  %v2500_v34 = vpack.c.bf16 %v1694_v31, %v1693_v10 }
 0x2a6   :  { %2483 = vmatpush3.bf16.msra.mxu0 %v2482_v19  ;;  %2511 = vmatpush3.bf16.msra.mxu1 %v2510_v13  ;;  %v2528_v36 = vpack.c.bf16 %v1724_v38, %v1723_v27  ;;  %v1726_v13 = vld [vmem:[%s3731_s6 + $0x1e8] sm:$0xff] }
 0x2a7   :  { %2485 = vmatprep.subr.bf16.mxu0 %v2484_v9  ;;  %2513 = vmatprep.subr.bf16.mxu1 %v2512_v46  ;;  %v2506_v46 = vpack.c.bf16 %v1680_v55, %v1679_v14  ;;  %v2596_v55 = vmov 0.0|0.0  }
 0x2a8   :  { %1548 = vmatmul.mubr.f32.gmra.mrb[8].mxu0 %v1359_v6  ;;  %1631 = vmatmul.mubr.f32.gmra.mrb[6].mxu1 %v1357_v43  ;;  %v1696_v43 = vld [vmem:[%s3731_s6 + $0xf8] sm:$0xff] }
 0x2a9   :  { %2249 = vmatprep.mubr.msk.f32.mxu0 %vm682_vm9, %v1362_v8  ;;  %2252 = vmatprep.mubr.msk.f32.mxu1 %vm682_vm9, %v1360_v15  ;;  %v1725_v15 = vld [vmem:[%s3731_s6 + $0x1e0] sm:$0xff]  ;;  %v2504_v19 = vpack.c.bf16 %v1696_v43, %v1695_v41 }
 0x2aa   :  { %2487 = vmatpush3.bf16.msra.mxu0 %v2486_v52  ;;  %2515 = vmatpush3.bf16.msra.mxu1 %v2514_v17  ;;  %v2532_v9 = vpack.c.bf16 %v1726_v13, %v1725_v15  ;;  %v1442_v17 = vpop.permute.xlu1 %1441 }
 0x2ab   :  { %2489 = vmatprep.subr.bf16.mxu0 %v2488_v57  ;;  %2517 = vmatprep.subr.bf16.mxu1 %v2516_v2  ;;  %v1447_v39 = vpop.permute.xlu0 %1446 }
 0x2ac   :  { %1554 = vmatmul.mubr.f32.gmra.mrb[10].mxu0 %v1361_v5  ;;  %1637 = vmatmul.mubr.f32.gmra.mrb[8].mxu1 %v1359_v6  ;;  %v1711_v6 = vld [vmem:[%s3731_s6 + $0x170] sm:$0xff] }
 0x2ad   :  { %2253 = vmatprep.mubr.msk.f32.mxu1 %vm682_vm9, %v1362_v8  ;;  %v1712_v8 = vld [vmem:[%s3731_s6 + $0x178] sm:$0xff] }
 0x2ae   :  { %2491 = vmatpush3.bf16.msra.mxu0 %v2490_v3  ;;  %2519 = vmatpush3.bf16.msra.mxu1 %v2518_v7  ;;  %v2538_v52 = vpack.c.bf16 %v1712_v8, %v1711_v6  ;;  %v1933_v8 = vld [vmem:[%s3733_s9 + $0x10] sm:$0xff] }
 0x2af   :  { %2493 = vmatprep.subr.bf16.mxu0 %v2492_v35  ;;  %2521 = vmatprep.subr.bf16.mxu1 %v2520_v0  ;;  %v1452_v35 = vpop.permute.xlu1 %1451 }
 0x2b0   :  { %1643 = vmatmul.mubr.f32.gmra.mrb[10].mxu1 %v1361_v5 }
 0x2b2   :  { %2495 = vmatpush3.bf16.msra.mxu0 %v2494_v26  ;;  %2523 = vmatpush3.bf16.msra.mxu1 %v2522_v47 }
 0x2b3   :  { %2497 = vmatprep.subr.bf16.mxu0 %v2496_v30  ;;  %2525 = vmatprep.subr.bf16.mxu1 %v2524_v12  ;;  %v1457_v12 = vpop.permute.xlu0 %1456 }
 0x2b6   :  { %2499 = vmatpush3.bf16.msra.mxu0 %v2498_v25  ;;  %2527 = vmatpush3.bf16.msra.mxu1 %v2526_v48 }
 0x2b7   :  { %2501 = vmatprep.subr.bf16.mxu0 %v2500_v34  ;;  %2529 = vmatprep.subr.bf16.mxu1 %v2528_v36 }
 0x2ba   :  { %2503 = vmatpush3.bf16.msra.mxu0 %v2502_v29  ;;  %2531 = vmatpush3.bf16.msra.mxu1 %v2530_v1 }
 0x2bb   :  { %2505 = vmatprep.subr.bf16.mxu0 %v2504_v19  ;;  %2533 = vmatprep.subr.bf16.mxu1 %v2532_v9  ;;  %v1936_v9 = vld [vmem:[%s3732_s10] sm:$0xff] }
 0x2be   :  { %2507 = vmatpush3.bf16.msra.mxu0 %v2506_v46  ;;  %2535 = vmatpush3.bf16.msra.mxu1 %v2534_v11  ;;  %v1937_v46 = vld [vmem:[%s3732_s10 + $0x8] sm:$0xff] }
 0x2bf   :  { %2537 = vmatprep.subr.bf16.mxu1 %v2536_v61  ;;  %2540 = vmatprep.subr.bf16.mxu0 %v2596_v55  ;;  %v2541_v56 = vpack.c.bf16 %v1937_v46, %v1936_v9  ;;  %v1932_v11 = vld [vmem:[%s3733_s9 + $0x8] sm:$0xff]  ;;  %v3752_v61 = vmov 0.0   ;;  %v2126_v46 = vld [vmem:[%s3737_s12 + $0x10] sm:$0xff] }
 0x2c0   :  { %v2547_v6 = vpack.c.bf16 %v1932_v11, %v1931_v49  ;;  %v2125_v9 = vld [vmem:[%s3737_s12 + $0x8] sm:$0xff]  ;;  %v2127_v11 = vld [vmem:[%s3737_s12 + $0x18] sm:$0xff]  ;;  %2210 = vst [vmem:[%s3738_s14] sm:$0x3] %v3752_v61 }
 0x2c2   :  { %2539 = vmatpush3.bf16.msra.mxu1 %v2538_v52  ;;  %v1934_v52 = vld [vmem:[%s3733_s9 + $0x18] sm:$0xff] }
 0x2c3   :  { %2546 = vmatprep.subr.bf16.mxu1 %v2596_v55 }
 0x373   :  { %v1537_v62 = vpop.f32.mrb[4].mxu0 }
 0x374   :  { %v1538_v50 = vadd.f32 %v1537_v62, %v1442_v17  ;;  %v1539_v57 = vpop.f32.mrb[5].mxu0  ;;  %v2550_v62 = vpack.c.bf16 %v1934_v52, %v1933_v8 }
 0x375   :  { %v1540_v2 = vadd.f32 %v1539_v57, %v1442_v17 }
 0x376   :  { %v1649_v37 = vmax.f32 %v1538_v50, 0.0  ;;  %v1935_v50 = vld [vmem:[%s3734_s7] sm:$0x3] }
 0x377   :  { %v1650_v59 = vmax.f32 %v1540_v2, 0.0  ;;  %v1543_v23 = vpop.f32.mrb[6].mxu0  ;;  %v1626_v20 = vpop.f32.mrb[4].mxu1 }
 0x378   :  { %v1544_v60 = vadd.f32 %v1543_v23, %v1447_v39  ;;  %v1627_v5 = vadd.f32 %v1626_v20, %v1442_v17  ;;  %v1545_v3 = vpop.f32.mrb[7].mxu0  ;;  %v1628_v7 = vpop.f32.mrb[5].mxu1 }
 0x379   :  { %v1546_v63 = vadd.f32 %v1545_v3, %v1447_v39  ;;  %v1629_v28 = vadd.f32 %v1628_v7, %v1442_v17  ;;  %1793 = vmatprep.mubr.f32.mxu0 %v1650_v59  ;;  %v2544_v17 = vpack.c.bf16 %v1939_v44, %v1938_v4  ;;  %v2556_v4 = vpack.c.bf16 %v2127_v11, %v2126_v46 }
 0x37a   :  { %1794 = vmatmul.mubr.f32.vlgmr.msra.gmra.mrb[12].mxu0 %v1649_v37  ;;  %v1653_v40 = vmax.f32 %v1544_v60, 0.0  ;;  %v1651_v53 = vmax.f32 %v1627_v5, 0.0 }
 0x37b   :  { %v1654_v0 = vmax.f32 %v1546_v63, 0.0  ;;  %v1652_v32 = vmax.f32 %v1629_v28, 0.0  ;;  %v1549_v42 = vpop.f32.mrb[8].mxu0  ;;  %v1632_v24 = vpop.f32.mrb[6].mxu1  ;;  %2542 = vmatpush3.bf16.msra.mxu0 %v2541_v56 }
 0x37c   :  { %v1550_v51 = vadd.f32 %v1549_v42, %v1452_v35  ;;  %v1633_v26 = vadd.f32 %v1632_v24, %v1447_v39  ;;  %v1551_v47 = vpop.f32.mrb[9].mxu0  ;;  %v1634_v21 = vpop.f32.mrb[7].mxu1  ;;  %2543 = vmatprep.subr.bf16.mxu0 %v2596_v55 }
 0x37d   :  { %v1552_v45 = vadd.f32 %v1551_v47, %v1452_v35  ;;  %v1635_v30 = vadd.f32 %v1634_v21, %v1447_v39  ;;  %1798 = vmatprep.mubr.f32.mxu0 %v1654_v0  ;;  %1878 = vmatprep.mubr.f32.mxu1 %v1652_v32 }
 0x37e   :  { %1799 = vmatmul.mubr.f32.gmra.mrb[14].mxu0 %v1653_v40  ;;  %1879 = vmatmul.mubr.f32.vlgmr.msra.gmra.mrb[12].mxu1 %v1651_v53  ;;  %v1657_v27 = vmax.f32 %v1550_v51, 0.0  ;;  %v1655_v38 = vmax.f32 %v1633_v26, 0.0 }
 0x37f   :  { %v1658_v18 = vmax.f32 %v1552_v45, 0.0  ;;  %v1656_v16 = vmax.f32 %v1635_v30, 0.0  ;;  %v1555_v10 = vpop.f32.mrb[10].mxu0  ;;  %v1638_v31 = vpop.f32.mrb[8].mxu1  ;;  %2548 = vmatpush3.bf16.msra.mxu1 %v2547_v6  ;;  %2545 = vmatpush3.bf16.msra.mxu0 %v2544_v17 }
 0x380   :  { %v1556_v25 = vadd.f32 %v1555_v10, %v1457_v12  ;;  %v1639_v48 = vadd.f32 %v1638_v31, %v1452_v35  ;;  %v1557_v34 = vpop.f32.mrb[11].mxu0  ;;  %v1640_v36 = vpop.f32.mrb[9].mxu1  ;;  %2549 = vmatprep.subr.bf16.mxu1 %v2596_v55  ;;  %2552 = vmatprep.subr.bf16.mxu0 %v2596_v55 }
 0x381   :  { %v1558_v33 = vadd.f32 %v1557_v34, %v1457_v12  ;;  %v1641_v22 = vadd.f32 %v1640_v36, %v1452_v35  ;;  %1803 = vmatprep.mubr.f32.mxu0 %v1658_v18  ;;  %1883 = vmatprep.mubr.f32.mxu1 %v1656_v16 }
 0x382   :  { %1804 = vmatmul.mubr.f32.gmra.mrb[16].mxu0 %v1657_v27  ;;  %1884 = vmatmul.mubr.f32.gmra.mrb[14].mxu1 %v1655_v38  ;;  %v1661_v1 = vmax.f32 %v1556_v25, 0.0  ;;  %v1659_v41 = vmax.f32 %v1639_v48, 0.0  ;;  %v2256_v38 = vld [vmem:[%s3735_s11] ss:$0 sm:$0xff] }
 0x383   :  { %v1662_v54 = vmax.f32 %v1558_v33, 0.0  ;;  %v1660_v29 = vmax.f32 %v1641_v22, 0.0  ;;  %v1644_v58 = vpop.f32.mrb[10].mxu1  ;;  %2551 = vmatpush3.bf16.msra.mxu1 %v2550_v62  ;;  %v2102_v33 = vld [vmem:[%s3736_s8] sm:$0x3] }
 0x384   :  { %v1645_v43 = vadd.f32 %v1644_v58, %v1457_v12  ;;  %v1646_v15 = vpop.f32.mrb[11].mxu1 }
 0x385   :  { %v1647_v19 = vadd.f32 %v1646_v15, %v1457_v12  ;;  %1808 = vmatprep.mubr.f32.mxu0 %v1662_v54  ;;  %1888 = vmatprep.mubr.f32.mxu1 %v1660_v29 }
 0x386   :  { %1809 = vmatmul.mubr.f32.gmra.mrb[18].mxu0 %v1661_v1  ;;  %1889 = vmatmul.mubr.f32.gmra.mrb[16].mxu1 %v1659_v41  ;;  %v1663_v14 = vmax.f32 %v1645_v43, 0.0 }
 0x387   :  { %v1664_v13 = vmax.f32 %v1647_v19, 0.0  ;;  %2371 = vmatprep.mubr.msk.f32.mxu0 %vm2597_vm10, %v3752_v61 }
 0x389   :  { %1893 = vmatprep.mubr.f32.mxu1 %v1664_v13 }
 0x38a   :  { %1894 = vmatmul.mubr.f32.gmra.mrb[18].mxu1 %v1663_v14  ;;  %2372 = vmatmul.mubr.msk.f32.vlgmr.msra.gmra.mrb[20].mxu0 %vm1940_vm11, %v1935_v50  ;;  %v2124_v14 = vld [vmem:[%s3737_s12] sm:$0xff] }
 0x38b   :  { %2382 = vmatprep.mubr.msk.f32.mxu1 %vm2597_vm10, %v3752_v61  ;;  %2393 = vmatprep.mubr.msk.f32.mxu0 %vm2597_vm10, %v3752_v61  ;;  %v2553_v56 = vpack.c.bf16 %v2125_v9, %v2124_v14 }
 0x38d   :  { %2554 = vmatpush3.bf16.msra.mxu0 %v2553_v56 }
 0x38e   :  { %2555 = vmatprep.subr.bf16.mxu0 %v2596_v55  ;;  %v2258_v55 = vld [vmem:[%s3739_s13] ss:$0 sm:$0xff] }
 0x391   :  { %2557 = vmatpush3.bf16.msra.mxu0 %v2556_v4 }
 0x44d   :  { %v2292_v57 = vpop.f32.mrb[12].mxu0 }
 0x44e   :  { %v2293_v2 = vpop.f32.mrb[13].mxu0 }
 0x44f   :  { %v2294_v39 = vadd.f32 %v2293_v2, %v2292_v57 }
 0x451   :  { %v2295_v59 = vpop.f32.mrb[14].mxu0  ;;  %v2336_v23 = vpop.f32.mrb[12].mxu1 }
 0x452   :  { %v2296_v20 = vpop.f32.mrb[15].mxu0  ;;  %v2337_v37 = vpop.f32.mrb[13].mxu1 }
 0x453   :  { %v2297_v60 = vadd.f32 %v2296_v20, %v2295_v59  ;;  %v2338_v5 = vadd.f32 %v2337_v37, %v2336_v23 }
 0x455   :  { %v1881_v3 = vadd.f32 %v2338_v5, %v2294_v39  ;;  %v2298_v7 = vpop.f32.mrb[16].mxu0  ;;  %v2339_v63 = vpop.f32.mrb[14].mxu1 }
 0x456   :  { %v2299_v28 = vpop.f32.mrb[17].mxu0  ;;  %v2340_v35 = vpop.f32.mrb[15].mxu1 }
 0x457   :  { %v2300_v0 = vadd.f32 %v2299_v28, %v2298_v7  ;;  %v2341_v32 = vadd.f32 %v2340_v35, %v2339_v63  ;;  %1899 = vxpose.xlu1.b32.start [1/4] (short) (narrow) %v1881_v3, 8 }
 0x459   :  { %v1886_v42 = vadd.f32 %v2341_v32, %v2297_v60  ;;  %v2301_v24 = vpop.f32.mrb[18].mxu0  ;;  %v2342_v40 = vpop.f32.mrb[16].mxu1 }
 0x45a   :  { %v2302_v53 = vpop.f32.mrb[19].mxu0  ;;  %v2343_v51 = vpop.f32.mrb[17].mxu1 }
 0x45b   :  { %v2303_v26 = vadd.f32 %v2302_v53, %v2301_v24  ;;  %v2344_v47 = vadd.f32 %v2343_v51, %v2342_v40  ;;  %1900 = vxpose.xlu1.b32.cont [2/4] (short) (narrow) %v1886_v42, 8 }
 0x45d   :  { %v1891_v21 = vadd.f32 %v2344_v47, %v2300_v0  ;;  %v2345_v45 = vpop.f32.mrb[18].mxu1  ;;  %v2010_v16 = vpop.f32.mrb[20].mxu0 }
 0x45e   :  { %v2346_v30 = vpop.f32.mrb[19].mxu1  ;;  %v2373_v10 = vpop.f32.mrb[21].mxu0 }
 0x45f   :  { %v2347_v12 = vadd.f32 %v2346_v30, %v2345_v45  ;;  %1901 = vxpose.xlu1.b32.cont [3/4] (short) (narrow) %v1891_v21, 8 }
 0x461   :  { %v1896_v18 = vadd.f32 %v2347_v12, %v2303_v26 }
 0x463   :  { %1902 = vxpose.xlu1.b32.end [4/4] (short) (narrow) %v1896_v18, 8 }
 0x4d7   :  { %v1915_v31 = vpop.trf.xlu1 }
 0x4d8   :  { %2383 = vmatmul.mubr.msk.f32.vlgmr.msra.gmra.mrb[20].mxu1 %vm1940_vm11, %v1915_v31 }
 0x5ab   :  { %v2083_v27 = vpop.f32.mrb[20].mxu1 }
 0x5ac   :  { %v2084_v25 = vadd.f32 %v2083_v27, %v2010_v16  ;;  %v2384_v48 = vpop.f32.mrb[21].mxu1 }
 0x5ae   :  { %v2094_v34 = vadd.f32 %v2256_v38, %v2084_v25 }
 0x5b0   :  { %2577 = vtanh.f32 %v2094_v34  ;;  %v2257_v22 = vmul.f32 -1.442695, %v2094_v34 }
 0x5b2   :  { %2579 = vpow2.f32 %v2257_v22 }
 0x5ba   :  { %v2578_v36 = vpop.eup %2577 }
 0x5bb   :  { %2109 = vrot.lane.b32.xlu0 %v2578_v36, %s2598_s3 }
 0x5bc   :  { %v2580_v54 = vpop.eup %2579 }
 0x5bd   :  { %v2098_v29 = vadd.f32 1.0, %v2580_v54 }
 0x5bf   :  { %2104 = vrot.lane.b32.xlu0 %v2102_v33, %s2599_s30  ;;  %2581 = vrcp.f32 %v2098_v29 }
 0x5c9   :  { %v2582_v58 = vpop.eup %2581 }
 0x62d   :  { %v2110_v1 = vpop.permute.xlu0 %2109 }
 0x62e   :  { %v2112_v41 = vmul.f32 %v2582_v58, %v2110_v1 }
 0x630   :  { %2114 = vrot.lane.b32.xlu0 %v2112_v41, %s2599_s30 }
 0x631   :  { %v2105_v43 = vpop.permute.xlu0 %2104 }
 0x632   :  { %v2107_v15 = vmul.f32 %v2582_v58, %v2105_v43 }
 0x6a2   :  { %v2115_v19 = vpop.permute.xlu0 %2114 }
 0x6a3   :  { %v2117_v13 = vadd.f32 %v2115_v19, %v2107_v15 }
 0x6a5   :  { %2583 = vtanh.f32 %v2117_v13 }
 0x6af   :  { %v2584_v49 = vpop.eup %2583 }
 0x6b0   :  { %2120 = vrot.lane.b32.xlu0 %v2584_v49, %s2598_s3 }
 0x722   :  { %v2121_v44 = vpop.permute.xlu0 %2120 }
 0x723   :  { %v2123_v6 = vmul.f32 %v2582_v58, %v2121_v44 }
 0x725   :  { %2136 = vrot.lane.b32.xlu0 %v2123_v6, %s2599_s30 }
 0x729   :  { %2213 = vrot.lane.b32.xlu0 %v2123_v6, %s2600_s16 }
 0x72d   :  { %2219 = vrot.lane.b32.xlu0 %v2117_v13, %s2601_s17 }
 0x797   :  { %v2137_v8 = vpop.permute.xlu0 %2136 }
 0x798   :  { %2394 = vmatmul.mubr.msk.f32.vlgmr.msra.gmra.mrb[22].mxu0 %vm1940_vm11, %v2137_v8 }
 0x79b   :  { %v2214_v52 = vpop.permute.xlu0 %2213 }
 0x79f   :  { %v2220_v50 = vpop.permute.xlu0 %2219 }
 0x86b   :  { %v2206_v17 = vpop.f32.mrb[22].mxu0 }
 0x86c   :  { %v2207_v62 = vadd.f32 %v2258_v55, %v2206_v17  ;;  %v2395_v61 = vpop.f32.mrb[23].mxu0 }
 0x86e   :  { %2212 = vst.msk [vmem:[%s3738_s14] sm:$0x3] %vm2211_vm12, %v2207_v62 }
 0x86f   :  { %2217 = vst.msk [vmem:[%s3738_s14] sm:$0x3] %vm2216_vm13, %v2214_v52 }
 0x870   :  { %2223 = vst.msk [vmem:[%s3738_s14] sm:$0x3] %vm2222_vm14, %v2220_v50 }

</bundles_post_ra>
